<compile_context>
chip_gen: v7x
topology: tpu7x:2x2x1
jax: 0.10.0
libtpu: 0.0.40
codegen_flags: <defaults>
</compile_context>

<pallas_src>
import functools

import jax
import jax.numpy as jnp
from jax.experimental import pallas as pl
from jax.experimental.pallas import tpu as pltpu


def _ffn_kernel(x_ref, w1_ref, b1_ref, w2_ref, p_ref, o_ref, *scratch,
                eps, d_true, nsub, single_k):
    """One (tm, d_model_padded) row tile x one d_ff chunk."""
    acc_ref = scratch[0] if scratch else None
    k = pl.program_id(1)
    nk = pl.num_programs(1)

    if not single_k:
        @pl.when(k == 0)
        def _init():
            acc_ref[...] = jnp.zeros_like(acc_ref)

    # Packed small vectors: row 0 = b2, row 1 = gamma, row 2 = beta (f32).
    p = p_ref[...].astype(jnp.float32)
    b2, gamma, beta = p[0:1, :], p[1:2, :], p[2:3, :]
    b1 = b1_ref[...].astype(jnp.float32)          # (1, tk)

    tm, dmp = x_ref.shape
    sm = tm // nsub
    npad = dmp - d_true
    inv_d = 1.0 / float(d_true)

    def _ln_store(x_rows, y_rows, r0, r1):
        # residual add + LayerNorm over the true d_model, f32.
        z = x_rows.astype(jnp.float32) + y_rows + b2
        mean = jnp.sum(z, axis=-1, keepdims=True) * inv_d
        c = z - mean
        sq = jnp.sum(c * c, axis=-1, keepdims=True)
        if npad:
            # padded columns hold z == 0 exactly -> each contributes mean^2.
            sq = sq - float(npad) * mean * mean
        var = sq * inv_d
        zn = c * jax.lax.rsqrt(var + eps)
        o_ref[r0:r1, :] = (zn * gamma + beta).astype(o_ref.dtype)

    # Sub-chunk the row tile so the LN/VPU epilogue of chunk s overlaps the MXU
    # matmuls of chunk s+1 (one basic block; LLO scheduler co-issues the slots).
    for s in range(nsub):
        r0, r1 = s * sm, (s + 1) * sm
        x = x_ref[r0:r1, :]

        # linear1 + ReLU: MXU operands in the weight dtype, f32 accumulation.
        h = jnp.dot(x.astype(w1_ref.dtype), w1_ref[...],
                    preferred_element_type=jnp.float32)
        h = jnp.maximum(h + b1, 0.0)
        # dropout == identity (eval mode / p = 0)

        # linear2 (partial over this d_ff chunk).
        y = jnp.dot(h.astype(w2_ref.dtype), w2_ref[...],
                    preferred_element_type=jnp.float32)

        if single_k:
            _ln_store(x, y, r0, r1)
        else:
            partial = acc_ref[r0:r1, :] + y

            @pl.when(k < nk - 1)
            def _store_acc():
                acc_ref[r0:r1, :] = partial

            @pl.when(k == nk - 1)
            def _epilogue():
                _ln_store(x, partial, r0, r1)


def feedforward_mlp_residual(x, w1, b1, w2, b2, gamma, beta, *, eps=1e-5,
                             row_tile=None, use_bf16_matmul=False):
    """x: (batch, seq, d_model).  Weights stored as (in, out) (transposed vs torch)."""
    batch, seq, d_model = x.shape
    d_ff = w1.shape[1]
    rows = batch * seq

    # ---- generation-aware VMEM budget ------------------------------------
    try:
        cap = int(pltpu.get_tpu_info().vmem_capacity_bytes)
    except Exception:
        cap = 64 << 20                      # conservative (v7x per-TC capacity)
    budget = int(cap * 0.85)                # headroom for Mosaic internal scratch

    if row_tile is None:
        row_tile = 512 if cap >= (96 << 20) else 256   # v5e/v6e vs v7x

    # ---- optional bf16 MXU path (f32 accumulation, f32 LN) ----------------
    if use_bf16_matmul and w1.dtype == jnp.float32:
        w1 = w1.astype(jnp.bfloat16)
        w2 = w2.astype(jnp.bfloat16)
    w_itemsize = jnp.dtype(w1.dtype).itemsize
    x_itemsize = jnp.dtype(x.dtype).itemsize

    # ---- d_model padding to a lane-dense multiple of 128 ------------------
    dmp = ((d_model + 127) // 128) * 128
    pad_d = dmp - d_model

    # ---- row tile: multiple of 8, and >= 2 grid steps when possible -------
    tm = min(row_tile, max(8, ((rows + 7) // 8) * 8))
    rows_padded = ((rows + tm - 1) // tm) * tm
    while rows_padded // tm < 2 and tm > 8:
        tm = max(8, ((tm // 2 + 7) // 8) * 8)
        rows_padded = ((rows + tm - 1) // tm) * tm

    # ---- VMEM estimate & d_ff chunking fallback ---------------------------
    def _est(tk_, chunked):
        wbuf = 2 if chunked else 1          # double-buffered only when streamed
        weights = wbuf * (dmp * tk_ + tk_ + tk_ * dmp) * w_itemsize
        vecs = 8 * dmp * 4                  # packed b2/gamma/beta (sublane-padded)
        streamed = 2 * 2 * tm * dmp * x_itemsize      # x + out, double-buffered
        acc = tm * dmp * 4 if chunked else 0
        work = tm * tk_ * 4 + tm * dmp * 4            # h and y temporaries
        return weights + vecs + streamed + acc + work + (4 << 20)

    if _est(d_ff, False) <= budget:
        resident_weights = True
        tk, dffp = d_ff, d_ff
    else:
        resident_weights = False
        fixed = _est(0, True)
        per_tk = 2 * (2 * dmp + 1) * w_itemsize + tm * 4
        tk = max(128, ((budget - fixed) // per_tk) // 128 * 128) if budget > fixed else 128
        tk = min(tk, ((d_ff + 127) // 128) * 128)
        dffp = ((d_ff + tk - 1) // tk) * tk
    nk = dffp // tk
    single_k = nk == 1

    vmem_limit = int(min(max(_est(tk, not resident_weights), 32 << 20), budget))

    # ---- pad / pack operands ----------------------------------------------
    x2d = x.reshape(rows, d_model)
    if rows_padded != rows or pad_d:
        x2d = jnp.pad(x2d, ((0, rows_padded - rows), (0, pad_d)))
    pad_ff = dffp - d_ff
    w1p, b1p, w2p = w1, b1, w2
    if pad_d or pad_ff:
        w1p = jnp.pad(w1, ((0, pad_d), (0, pad_ff)))
        b1p = jnp.pad(b1, ((0, pad_ff),))
        w2p = jnp.pad(w2, ((0, pad_ff), (0, pad_d)))
    b1_2d = b1p.reshape(1, dffp)
    params = jnp.stack([b2, gamma, beta], axis=0).astype(jnp.float32)   # (3, d_model)
    if pad_d:
        params = jnp.pad(params, ((0, 0), (0, pad_d)))

    # Row sub-chunking inside the body (MXU / LN-epilogue overlap).
    nsub = 2 if (tm >= 64 and tm % 16 == 0) else 1

    kernel = functools.partial(_ffn_kernel, eps=eps, d_true=d_model,
                               nsub=nsub, single_k=single_k)
    scratch = [] if single_k else [pltpu.VMEM((tm, dmp), jnp.float32)]

    def _call(use_buffered):
        def _spec(shape, imap, resident):
            if resident and use_buffered:
                return pl.BlockSpec(shape, imap, pipeline_mode=pl.Buffered(1))
            return pl.BlockSpec(shape, imap)

        in_specs = [
            _spec((tm, dmp), lambda i, k: (i, 0), False),              # x (streamed)
            _spec((dmp, tk), lambda i, k: (0, k), resident_weights),   # W1
            _spec((1, tk), lambda i, k: (0, k), resident_weights),     # b1
            _spec((tk, dmp), lambda i, k: (k, 0), resident_weights),   # W2
            _spec((3, dmp), lambda i, k: (0, 0), True),                # b2/gamma/beta
        ]
        return pl.pallas_call(
            kernel,
            out_shape=jax.ShapeDtypeStruct((rows_padded, dmp), x.dtype),
            grid_spec=pltpu.PrefetchScalarGridSpec(
                num_scalar_prefetch=0,
                grid=(rows_padded // tm, nk),
                in_specs=in_specs,
                out_specs=pl.BlockSpec((tm, dmp), lambda i, k: (i, 0)),
                scratch_shapes=scratch,
            ),
            compiler_params=pltpu.CompilerParams(
                dimension_semantics=("parallel", "arbitrary"),
                vmem_limit_bytes=vmem_limit,
            ),
        )(x2d, w1p, b1_2d, w2p, params)

    try:
        out2d = jax.block_until_ready(_call(True))
    except Exception:
        # Fallback in case pl.Buffered(1) is rejected by this Mosaic build.
        out2d = _call(False)

    return out2d[:rows, :d_model].reshape(batch, seq, d_model)


def _reference(x, w1, b1, w2, b2, gamma, beta, eps=1e-5):
    h = jnp.maximum(x @ w1 + b1, 0.0)
    y = h @ w2 + b2
    z = x + y
    mean = jnp.mean(z, axis=-1, keepdims=True)
    var = jnp.mean((z - mean) ** 2, axis=-1, keepdims=True)
    return (z - mean) / jnp.sqrt(var + eps) * gamma + beta


if __name__ == "__main__":
    # Small shapes: batch=2, seq=64, d_model=32, dim_feedforward=64.
    # (Exercises d_model padding, >=2 row grid steps and the 2-way sub-chunking.)
    batch, seq, d_model, d_ff = 2, 64, 32, 64

    key = jax.random.PRNGKey(0)
    kx, k1, kb1, k2, kb2 = jax.random.split(key, 5)

    x = jax.random.normal(kx, (batch, seq, d_model), dtype=jnp.float32)
    # Deterministic parameter init (scaled-normal; weights stored as (in, out)).
    w1 = jax.random.normal(k1, (d_model, d_ff), dtype=jnp.float32) / jnp.sqrt(d_model)
    b1 = jax.random.normal(kb1, (d_ff,), dtype=jnp.float32) * 0.01
    w2 = jax.random.normal(k2, (d_ff, d_model), dtype=jnp.float32) / jnp.sqrt(d_ff)
    b2 = jax.random.normal(kb2, (d_model,), dtype=jnp.float32) * 0.01
    gamma = jnp.ones((d_model,), dtype=jnp.float32)
    beta = jnp.zeros((d_model,), dtype=jnp.float32)

    out = feedforward_mlp_residual(x, w1, b1, w2, b2, gamma, beta)
    out = jax.block_until_ready(out)

    ref = _reference(x, w1, b1, w2, b2, gamma, beta)
    assert out.shape == (batch, seq, d_model)
    assert jnp.allclose(out, ref, atol=1e-5, rtol=1e-5), "mismatch vs reference"

    print("KERNEL_OK")
</pallas_src>

<mosaic_0001>
module attributes {stable_mosaic.version = 11 : i64} {
  func.func @_ffn_kernel(%arg0: i32, %arg1: i32, %arg2: memref<64x128xf32, #tpu.memory_space<vmem>>, %arg3: memref<128x64xf32, #tpu.memory_space<vmem>>, %arg4: memref<1x64xf32, #tpu.memory_space<vmem>>, %arg5: memref<64x128xf32, #tpu.memory_space<vmem>>, %arg6: memref<3x128xf32, #tpu.memory_space<vmem>>, %arg7: memref<64x128xf32, #tpu.memory_space<vmem>>) attributes {dimension_semantics = [#tpu.dimension_semantics<parallel>, #tpu.dimension_semantics<arbitrary>], iteration_bounds = array<i64: 2, 1>, scalar_prefetch = 0 : i64, scratch_operands = 0 : i64, tpu.core_type = #tpu.core_type<tc>, window_params = [{transform_indices = @transform_0, window_bounds = array<i64: 64, 128>}, {pipeline_mode = #tpu.pipeline_mode<synchronous>, transform_indices = @transform_1, window_bounds = array<i64: 128, 64>}, {pipeline_mode = #tpu.pipeline_mode<synchronous>, transform_indices = @transform_2, window_bounds = array<i64: 1, 64>}, {pipeline_mode = #tpu.pipeline_mode<synchronous>, transform_indices = @transform_3, window_bounds = array<i64: 64, 128>}, {pipeline_mode = #tpu.pipeline_mode<synchronous>, transform_indices = @transform_4, window_bounds = array<i64: 3, 128>}, {transform_indices = @transform_5, window_bounds = array<i64: 64, 128>}]} {
    %c0 = arith.constant 0 : index
    %c0_0 = arith.constant 0 : index
    %0 = vector.load %arg6[%c0, %c0_0] : memref<3x128xf32, #tpu.memory_space<vmem>>, vector<3x128xf32>
    %1 = vector.extract_strided_slice %0 {offsets = [0, 0], sizes = [1, 128], strides = [1, 1]} : vector<3x128xf32> to vector<1x128xf32>
    %2 = vector.extract_strided_slice %0 {offsets = [1, 0], sizes = [1, 128], strides = [1, 1]} : vector<3x128xf32> to vector<1x128xf32>
    %3 = vector.extract_strided_slice %0 {offsets = [2, 0], sizes = [1, 128], strides = [1, 1]} : vector<3x128xf32> to vector<1x128xf32>
    %c0_1 = arith.constant 0 : index
    %c0_2 = arith.constant 0 : index
    %4 = vector.load %arg4[%c0_1, %c0_2] : memref<1x64xf32, #tpu.memory_space<vmem>>, vector<1x64xf32>
    %c0_3 = arith.constant 0 : index
    %c0_4 = arith.constant 0 : index
    %5 = vector.load %arg2[%c0_3, %c0_4] : memref<64x128xf32, #tpu.memory_space<vmem>>, vector<32x128xf32>
    %c0_5 = arith.constant 0 : index
    %c0_6 = arith.constant 0 : index
    %6 = vector.load %arg3[%c0_5, %c0_6] : memref<128x64xf32, #tpu.memory_space<vmem>>, vector<128x64xf32>
    %cst = arith.constant dense<0.000000e+00> : vector<32x64xf32>
    %7 = tpu.matmul %5, %6, %cst {dimension_numbers = #tpu.dot_dimension_numbers<[1], [0], [0], [1], [0, 0, 1, 1], [], []>} : vector<32x128xf32>, vector<128x64xf32>, vector<32x64xf32> -> vector<32x64xf32>
    %8 = vector.broadcast %4 : vector<1x64xf32> to vector<32x64xf32>
    %9 = arith.addf %7, %8 : vector<32x64xf32>
    %cst_7 = arith.constant 0.000000e+00 : f32
    %10 = vector.broadcast %cst_7 : f32 to vector<32x64xf32>
    %11 = arith.maximumf %9, %10 : vector<32x64xf32>
    %c0_8 = arith.constant 0 : index
    %c0_9 = arith.constant 0 : index
    %12 = vector.load %arg5[%c0_8, %c0_9] : memref<64x128xf32, #tpu.memory_space<vmem>>, vector<64x128xf32>
    %cst_10 = arith.constant dense<0.000000e+00> : vector<32x128xf32>
    %13 = tpu.matmul %11, %12, %cst_10 {dimension_numbers = #tpu.dot_dimension_numbers<[1], [0], [0], [1], [0, 0, 1, 1], [], []>} : vector<32x64xf32>, vector<64x128xf32>, vector<32x128xf32> -> vector<32x128xf32>
    %14 = arith.addf %5, %13 : vector<32x128xf32>
    %15 = vector.broadcast %1 : vector<1x128xf32> to vector<32x128xf32>
    %16 = arith.addf %14, %15 : vector<32x128xf32>
    %cst_11 = arith.constant dense<0.000000e+00> : vector<32xf32>
    %17 = vector.multi_reduction <add>, %16, %cst_11 [1] : vector<32x128xf32> to vector<32xf32>
    %18 = vector.shape_cast %17 : vector<32xf32> to vector<32x1xf32>
    %cst_12 = arith.constant 3.125000e-02 : f32
    %19 = vector.broadcast %cst_12 : f32 to vector<32x1xf32>
    %20 = arith.mulf %18, %19 : vector<32x1xf32>
    %21 = vector.broadcast %20 : vector<32x1xf32> to vector<32x128xf32>
    %22 = arith.subf %16, %21 : vector<32x128xf32>
    %23 = arith.mulf %22, %22 : vector<32x128xf32>
    %cst_13 = arith.constant dense<0.000000e+00> : vector<32xf32>
    %24 = vector.multi_reduction <add>, %23, %cst_13 [1] : vector<32x128xf32> to vector<32xf32>
    %25 = vector.shape_cast %24 : vector<32xf32> to vector<32x1xf32>
    %cst_14 = arith.constant 9.600000e+01 : f32
    %26 = vector.broadcast %cst_14 : f32 to vector<32x1xf32>
    %27 = arith.mulf %26, %20 : vector<32x1xf32>
    %28 = arith.mulf %27, %20 : vector<32x1xf32>
    %29 = arith.subf %25, %28 : vector<32x1xf32>
    %cst_15 = arith.constant 3.125000e-02 : f32
    %30 = vector.broadcast %cst_15 : f32 to vector<32x1xf32>
    %31 = arith.mulf %29, %30 : vector<32x1xf32>
    %cst_16 = arith.constant 9.99999974E-6 : f32
    %32 = vector.broadcast %cst_16 : f32 to vector<32x1xf32>
    %33 = arith.addf %31, %32 : vector<32x1xf32>
    %34 = math.rsqrt %33 : vector<32x1xf32>
    %35 = vector.broadcast %34 : vector<32x1xf32> to vector<32x128xf32>
    %36 = arith.mulf %22, %35 : vector<32x128xf32>
    %37 = vector.broadcast %2 : vector<1x128xf32> to vector<32x128xf32>
    %38 = arith.mulf %36, %37 : vector<32x128xf32>
    %39 = vector.broadcast %3 : vector<1x128xf32> to vector<32x128xf32>
    %40 = arith.addf %38, %39 : vector<32x128xf32>
    %c0_17 = arith.constant 0 : index
    %c0_18 = arith.constant 0 : index
    %41 = vector.load %arg7[%c0_17, %c0_18] : memref<64x128xf32, #tpu.memory_space<vmem>>, vector<32x128xf32>
    tpu.vector_store %arg7[%c0_17, %c0_18], %40 {strides = array<i32>} : memref<64x128xf32, #tpu.memory_space<vmem>>, vector<32x128xf32>,
    %c32 = arith.constant 32 : index
    %c0_19 = arith.constant 0 : index
    %42 = vector.load %arg2[%c32, %c0_19] : memref<64x128xf32, #tpu.memory_space<vmem>>, vector<32x128xf32>
    %c0_20 = arith.constant 0 : index
    %c0_21 = arith.constant 0 : index
    %43 = vector.load %arg3[%c0_20, %c0_21] : memref<128x64xf32, #tpu.memory_space<vmem>>, vector<128x64xf32>
    %cst_22 = arith.constant dense<0.000000e+00> : vector<32x64xf32>
    %44 = tpu.matmul %42, %43, %cst_22 {dimension_numbers = #tpu.dot_dimension_numbers<[1], [0], [0], [1], [0, 0, 1, 1], [], []>} : vector<32x128xf32>, vector<128x64xf32>, vector<32x64xf32> -> vector<32x64xf32>
    %45 = vector.broadcast %4 : vector<1x64xf32> to vector<32x64xf32>
    %46 = arith.addf %44, %45 : vector<32x64xf32>
    %cst_23 = arith.constant 0.000000e+00 : f32
    %47 = vector.broadcast %cst_23 : f32 to vector<32x64xf32>
    %48 = arith.maximumf %46, %47 : vector<32x64xf32>
    %c0_24 = arith.constant 0 : index
    %c0_25 = arith.constant 0 : index
    %49 = vector.load %arg5[%c0_24, %c0_25] : memref<64x128xf32, #tpu.memory_space<vmem>>, vector<64x128xf32>
    %cst_26 = arith.constant dense<0.000000e+00> : vector<32x128xf32>
    %50 = tpu.matmul %48, %49, %cst_26 {dimension_numbers = #tpu.dot_dimension_numbers<[1], [0], [0], [1], [0, 0, 1, 1], [], []>} : vector<32x64xf32>, vector<64x128xf32>, vector<32x128xf32> -> vector<32x128xf32>
    %51 = arith.addf %42, %50 : vector<32x128xf32>
    %52 = vector.broadcast %1 : vector<1x128xf32> to vector<32x128xf32>
    %53 = arith.addf %51, %52 : vector<32x128xf32>
    %cst_27 = arith.constant dense<0.000000e+00> : vector<32xf32>
    %54 = vector.multi_reduction <add>, %53, %cst_27 [1] : vector<32x128xf32> to vector<32xf32>
    %55 = vector.shape_cast %54 : vector<32xf32> to vector<32x1xf32>
    %cst_28 = arith.constant 3.125000e-02 : f32
    %56 = vector.broadcast %cst_28 : f32 to vector<32x1xf32>
    %57 = arith.mulf %55, %56 : vector<32x1xf32>
    %58 = vector.broadcast %57 : vector<32x1xf32> to vector<32x128xf32>
    %59 = arith.subf %53, %58 : vector<32x128xf32>
    %60 = arith.mulf %59, %59 : vector<32x128xf32>
    %cst_29 = arith.constant dense<0.000000e+00> : vector<32xf32>
    %61 = vector.multi_reduction <add>, %60, %cst_29 [1] : vector<32x128xf32> to vector<32xf32>
    %62 = vector.shape_cast %61 : vector<32xf32> to vector<32x1xf32>
    %cst_30 = arith.constant 9.600000e+01 : f32
    %63 = vector.broadcast %cst_30 : f32 to vector<32x1xf32>
    %64 = arith.mulf %63, %57 : vector<32x1xf32>
    %65 = arith.mulf %64, %57 : vector<32x1xf32>
    %66 = arith.subf %62, %65 : vector<32x1xf32>
    %cst_31 = arith.constant 3.125000e-02 : f32
    %67 = vector.broadcast %cst_31 : f32 to vector<32x1xf32>
    %68 = arith.mulf %66, %67 : vector<32x1xf32>
    %cst_32 = arith.constant 9.99999974E-6 : f32
    %69 = vector.broadcast %cst_32 : f32 to vector<32x1xf32>
    %70 = arith.addf %68, %69 : vector<32x1xf32>
    %71 = math.rsqrt %70 : vector<32x1xf32>
    %72 = vector.broadcast %71 : vector<32x1xf32> to vector<32x128xf32>
    %73 = arith.mulf %59, %72 : vector<32x128xf32>
    %74 = vector.broadcast %2 : vector<1x128xf32> to vector<32x128xf32>
    %75 = arith.mulf %73, %74 : vector<32x128xf32>
    %76 = vector.broadcast %3 : vector<1x128xf32> to vector<32x128xf32>
    %77 = arith.addf %75, %76 : vector<32x128xf32>
    %c32_33 = arith.constant 32 : index
    %c0_34 = arith.constant 0 : index
    %78 = vector.load %arg7[%c32_33, %c0_34] : memref<64x128xf32, #tpu.memory_space<vmem>>, vector<32x128xf32>
    tpu.vector_store %arg7[%c32_33, %c0_34], %77 {strides = array<i32>} : memref<64x128xf32, #tpu.memory_space<vmem>>, vector<32x128xf32>,
    return
  }
  func.func @transform_0(%arg0: i32, %arg1: i32) -> (i32, i32) {
    %c0_i32 = arith.constant 0 : i32
    %c0_i32_0 = arith.constant 0 : i32
    return %arg0, %c0_i32 : i32, i32
  }
  func.func @transform_1(%arg0: i32, %arg1: i32) -> (i32, i32) {
    %c0_i32 = arith.constant 0 : i32
    %c0_i32_0 = arith.constant 0 : i32
    return %c0_i32, %arg1 : i32, i32
  }
  func.func @transform_2(%arg0: i32, %arg1: i32) -> (i32, i32) {
    %c0_i32 = arith.constant 0 : i32
    %c0_i32_0 = arith.constant 0 : i32
    return %c0_i32, %arg1 : i32, i32
  }
  func.func @transform_3(%arg0: i32, %arg1: i32) -> (i32, i32) {
    %c0_i32 = arith.constant 0 : i32
    %c0_i32_0 = arith.constant 0 : i32
    return %arg1, %c0_i32 : i32, i32
  }
  func.func @transform_4(%arg0: i32, %arg1: i32) -> (i32, i32) {
    %c0_i32 = arith.constant 0 : i32
    %c0_i32_0 = arith.constant 0 : i32
    %c0_i32_1 = arith.constant 0 : i32
    return %c0_i32, %c0_i32_0 : i32, i32
  }
  func.func @transform_5(%arg0: i32, %arg1: i32) -> (i32, i32) {
    %c0_i32 = arith.constant 0 : i32
    %c0_i32_0 = arith.constant 0 : i32
    return %arg0, %c0_i32 : i32, i32
  }
}

module attributes {stable_mosaic.version = 11 : i64} {
  func.func @_ffn_kernel(%arg0: i32, %arg1: i32, %arg2: memref<64x128xf32, #tpu.memory_space<vmem>>, %arg3: memref<128x64xf32, #tpu.memory_space<vmem>>, %arg4: memref<1x64xf32, #tpu.memory_space<vmem>>, %arg5: memref<64x128xf32, #tpu.memory_space<vmem>>, %arg6: memref<3x128xf32, #tpu.memory_space<vmem>>, %arg7: memref<64x128xf32, #tpu.memory_space<vmem>>) attributes {dimension_semantics = [#tpu.dimension_semantics<parallel>, #tpu.dimension_semantics<arbitrary>], iteration_bounds = array<i64: 2, 1>, scalar_prefetch = 0 : i64, scratch_operands = 0 : i64, tpu.core_type = #tpu.core_type<tc>, window_params = [{transform_indices = @transform_0, window_bounds = array<i64: 64, 128>}, {transform_indices = @transform_1, window_bounds = array<i64: 128, 64>}, {transform_indices = @transform_2, window_bounds = array<i64: 1, 64>}, {transform_indices = @transform_3, window_bounds = array<i64: 64, 128>}, {pipeline_mode = #tpu.pipeline_mode<synchronous>, transform_indices = @transform_4, window_bounds = array<i64: 3, 128>}, {transform_indices = @transform_5, window_bounds = array<i64: 64, 128>}]} {
    %c0 = arith.constant 0 : index
    %c0_0 = arith.constant 0 : index
    %0 = vector.load %arg6[%c0, %c0_0] : memref<3x128xf32, #tpu.memory_space<vmem>>, vector<3x128xf32>
    %1 = vector.extract_strided_slice %0 {offsets = [0, 0], sizes = [1, 128], strides = [1, 1]} : vector<3x128xf32> to vector<1x128xf32>
    %2 = vector.extract_strided_slice %0 {offsets = [1, 0], sizes = [1, 128], strides = [1, 1]} : vector<3x128xf32> to vector<1x128xf32>
    %3 = vector.extract_strided_slice %0 {offsets = [2, 0], sizes = [1, 128], strides = [1, 1]} : vector<3x128xf32> to vector<1x128xf32>
    %c0_1 = arith.constant 0 : index
    %c0_2 = arith.constant 0 : index
    %4 = vector.load %arg4[%c0_1, %c0_2] : memref<1x64xf32, #tpu.memory_space<vmem>>, vector<1x64xf32>
    %c0_3 = arith.constant 0 : index
    %c0_4 = arith.constant 0 : index
    %5 = vector.load %arg2[%c0_3, %c0_4] : memref<64x128xf32, #tpu.memory_space<vmem>>, vector<32x128xf32>
    %c0_5 = arith.constant 0 : index
    %c0_6 = arith.constant 0 : index
    %6 = vector.load %arg3[%c0_5, %c0_6] : memref<128x64xf32, #tpu.memory_space<vmem>>, vector<128x64xf32>
    %cst = arith.constant dense<0.000000e+00> : vector<32x64xf32>
    %7 = tpu.matmul %5, %6, %cst {dimension_numbers = #tpu.dot_dimension_numbers<[1], [0], [0], [1], [0, 0, 1, 1], [], []>} : vector<32x128xf32>, vector<128x64xf32>, vector<32x64xf32> -> vector<32x64xf32>
    %8 = vector.broadcast %4 : vector<1x64xf32> to vector<32x64xf32>
    %9 = arith.addf %7, %8 : vector<32x64xf32>
    %cst_7 = arith.constant 0.000000e+00 : f32
    %10 = vector.broadcast %cst_7 : f32 to vector<32x64xf32>
    %11 = arith.maximumf %9, %10 : vector<32x64xf32>
    %c0_8 = arith.constant 0 : index
    %c0_9 = arith.constant 0 : index
    %12 = vector.load %arg5[%c0_8, %c0_9] : memref<64x128xf32, #tpu.memory_space<vmem>>, vector<64x128xf32>
    %cst_10 = arith.constant dense<0.000000e+00> : vector<32x128xf32>
    %13 = tpu.matmul %11, %12, %cst_10 {dimension_numbers = #tpu.dot_dimension_numbers<[1], [0], [0], [1], [0, 0, 1, 1], [], []>} : vector<32x64xf32>, vector<64x128xf32>, vector<32x128xf32> -> vector<32x128xf32>
    %14 = arith.addf %5, %13 : vector<32x128xf32>
    %15 = vector.broadcast %1 : vector<1x128xf32> to vector<32x128xf32>
    %16 = arith.addf %14, %15 : vector<32x128xf32>
    %cst_11 = arith.constant dense<0.000000e+00> : vector<32xf32>
    %17 = vector.multi_reduction <add>, %16, %cst_11 [1] : vector<32x128xf32> to vector<32xf32>
    %18 = vector.shape_cast %17 : vector<32xf32> to vector<32x1xf32>
    %cst_12 = arith.constant 3.125000e-02 : f32
    %19 = vector.broadcast %cst_12 : f32 to vector<32x1xf32>
    %20 = arith.mulf %18, %19 : vector<32x1xf32>
    %21 = vector.broadcast %20 : vector<32x1xf32> to vector<32x128xf32>
    %22 = arith.subf %16, %21 : vector<32x128xf32>
    %23 = arith.mulf %22, %22 : vector<32x128xf32>
    %cst_13 = arith.constant dense<0.000000e+00> : vector<32xf32>
    %24 = vector.multi_reduction <add>, %23, %cst_13 [1] : vector<32x128xf32> to vector<32xf32>
    %25 = vector.shape_cast %24 : vector<32xf32> to vector<32x1xf32>
    %cst_14 = arith.constant 9.600000e+01 : f32
    %26 = vector.broadcast %cst_14 : f32 to vector<32x1xf32>
    %27 = arith.mulf %26, %20 : vector<32x1xf32>
    %28 = arith.mulf %27, %20 : vector<32x1xf32>
    %29 = arith.subf %25, %28 : vector<32x1xf32>
    %cst_15 = arith.constant 3.125000e-02 : f32
    %30 = vector.broadcast %cst_15 : f32 to vector<32x1xf32>
    %31 = arith.mulf %29, %30 : vector<32x1xf32>
    %cst_16 = arith.constant 9.99999974E-6 : f32
    %32 = vector.broadcast %cst_16 : f32 to vector<32x1xf32>
    %33 = arith.addf %31, %32 : vector<32x1xf32>
    %34 = math.rsqrt %33 : vector<32x1xf32>
    %35 = vector.broadcast %34 : vector<32x1xf32> to vector<32x128xf32>
    %36 = arith.mulf %22, %35 : vector<32x128xf32>
    %37 = vector.broadcast %2 : vector<1x128xf32> to vector<32x128xf32>
    %38 = arith.mulf %36, %37 : vector<32x128xf32>
    %39 = vector.broadcast %3 : vector<1x128xf32> to vector<32x128xf32>
    %40 = arith.addf %38, %39 : vector<32x128xf32>
    %c0_17 = arith.constant 0 : index
    %c0_18 = arith.constant 0 : index
    %41 = vector.load %arg7[%c0_17, %c0_18] : memref<64x128xf32, #tpu.memory_space<vmem>>, vector<32x128xf32>
    tpu.vector_store %arg7[%c0_17, %c0_18], %40 {strides = array<i32>} : memref<64x128xf32, #tpu.memory_space<vmem>>, vector<32x128xf32>,
    %c32 = arith.constant 32 : index
    %c0_19 = arith.constant 0 : index
    %42 = vector.load %arg2[%c32, %c0_19] : memref<64x128xf32, #tpu.memory_space<vmem>>, vector<32x128xf32>
    %c0_20 = arith.constant 0 : index
    %c0_21 = arith.constant 0 : index
    %43 = vector.load %arg3[%c0_20, %c0_21] : memref<128x64xf32, #tpu.memory_space<vmem>>, vector<128x64xf32>
    %cst_22 = arith.constant dense<0.000000e+00> : vector<32x64xf32>
    %44 = tpu.matmul %42, %43, %cst_22 {dimension_numbers = #tpu.dot_dimension_numbers<[1], [0], [0], [1], [0, 0, 1, 1], [], []>} : vector<32x128xf32>, vector<128x64xf32>, vector<32x64xf32> -> vector<32x64xf32>
    %45 = vector.broadcast %4 : vector<1x64xf32> to vector<32x64xf32>
    %46 = arith.addf %44, %45 : vector<32x64xf32>
    %cst_23 = arith.constant 0.000000e+00 : f32
    %47 = vector.broadcast %cst_23 : f32 to vector<32x64xf32>
    %48 = arith.maximumf %46, %47 : vector<32x64xf32>
    %c0_24 = arith.constant 0 : index
    %c0_25 = arith.constant 0 : index
    %49 = vector.load %arg5[%c0_24, %c0_25] : memref<64x128xf32, #tpu.memory_space<vmem>>, vector<64x128xf32>
    %cst_26 = arith.constant dense<0.000000e+00> : vector<32x128xf32>
    %50 = tpu.matmul %48, %49, %cst_26 {dimension_numbers = #tpu.dot_dimension_numbers<[1], [0], [0], [1], [0, 0, 1, 1], [], []>} : vector<32x64xf32>, vector<64x128xf32>, vector<32x128xf32> -> vector<32x128xf32>
    %51 = arith.addf %42, %50 : vector<32x128xf32>
    %52 = vector.broadcast %1 : vector<1x128xf32> to vector<32x128xf32>
    %53 = arith.addf %51, %52 : vector<32x128xf32>
    %cst_27 = arith.constant dense<0.000000e+00> : vector<32xf32>
    %54 = vector.multi_reduction <add>, %53, %cst_27 [1] : vector<32x128xf32> to vector<32xf32>
    %55 = vector.shape_cast %54 : vector<32xf32> to vector<32x1xf32>
    %cst_28 = arith.constant 3.125000e-02 : f32
    %56 = vector.broadcast %cst_28 : f32 to vector<32x1xf32>
    %57 = arith.mulf %55, %56 : vector<32x1xf32>
    %58 = vector.broadcast %57 : vector<32x1xf32> to vector<32x128xf32>
    %59 = arith.subf %53, %58 : vector<32x128xf32>
    %60 = arith.mulf %59, %59 : vector<32x128xf32>
    %cst_29 = arith.constant dense<0.000000e+00> : vector<32xf32>
    %61 = vector.multi_reduction <add>, %60, %cst_29 [1] : vector<32x128xf32> to vector<32xf32>
    %62 = vector.shape_cast %61 : vector<32xf32> to vector<32x1xf32>
    %cst_30 = arith.constant 9.600000e+01 : f32
    %63 = vector.broadcast %cst_30 : f32 to vector<32x1xf32>
    %64 = arith.mulf %63, %57 : vector<32x1xf32>
    %65 = arith.mulf %64, %57 : vector<32x1xf32>
    %66 = arith.subf %62, %65 : vector<32x1xf32>
    %cst_31 = arith.constant 3.125000e-02 : f32
    %67 = vector.broadcast %cst_31 : f32 to vector<32x1xf32>
    %68 = arith.mulf %66, %67 : vector<32x1xf32>
    %cst_32 = arith.constant 9.99999974E-6 : f32
    %69 = vector.broadcast %cst_32 : f32 to vector<32x1xf32>
    %70 = arith.addf %68, %69 : vector<32x1xf32>
    %71 = math.rsqrt %70 : vector<32x1xf32>
    %72 = vector.broadcast %71 : vector<32x1xf32> to vector<32x128xf32>
    %73 = arith.mulf %59, %72 : vector<32x128xf32>
    %74 = vector.broadcast %2 : vector<1x128xf32> to vector<32x128xf32>
    %75 = arith.mulf %73, %74 : vector<32x128xf32>
    %76 = vector.broadcast %3 : vector<1x128xf32> to vector<32x128xf32>
    %77 = arith.addf %75, %76 : vector<32x128xf32>
    %c32_33 = arith.constant 32 : index
    %c0_34 = arith.constant 0 : index
    %78 = vector.load %arg7[%c32_33, %c0_34] : memref<64x128xf32, #tpu.memory_space<vmem>>, vector<32x128xf32>
    tpu.vector_store %arg7[%c32_33, %c0_34], %77 {strides = array<i32>} : memref<64x128xf32, #tpu.memory_space<vmem>>, vector<32x128xf32>,
    return
  }
  func.func @transform_0(%arg0: i32, %arg1: i32) -> (i32, i32) {
    %c0_i32 = arith.constant 0 : i32
    %c0_i32_0 = arith.constant 0 : i32
    return %arg0, %c0_i32 : i32, i32
  }
  func.func @transform_1(%arg0: i32, %arg1: i32) -> (i32, i32) {
    %c0_i32 = arith.constant 0 : i32
    %c0_i32_0 = arith.constant 0 : i32
    return %c0_i32, %arg1 : i32, i32
  }
  func.func @transform_2(%arg0: i32, %arg1: i32) -> (i32, i32) {
    %c0_i32 = arith.constant 0 : i32
    %c0_i32_0 = arith.constant 0 : i32
    return %c0_i32, %arg1 : i32, i32
  }
  func.func @transform_3(%arg0: i32, %arg1: i32) -> (i32, i32) {
    %c0_i32 = arith.constant 0 : i32
    %c0_i32_0 = arith.constant 0 : i32
    return %arg1, %c0_i32 : i32, i32
  }
  func.func @transform_4(%arg0: i32, %arg1: i32) -> (i32, i32) {
    %c0_i32 = arith.constant 0 : i32
    %c0_i32_0 = arith.constant 0 : i32
    %c0_i32_1 = arith.constant 0 : i32
    return %c0_i32, %c0_i32_0 : i32, i32
  }
  func.func @transform_5(%arg0: i32, %arg1: i32) -> (i32, i32) {
    %c0_i32 = arith.constant 0 : i32
    %c0_i32_0 = arith.constant 0 : i32
    return %arg0, %c0_i32 : i32, i32
  }
}

</mosaic_0001>

<bundles_post_ra>
// kernel: tpu_custom_call.1
= control target key start
LH: loop header
LB: loop body
LE: loop exit
PB: predicated region body
PF: predicated region fallthrough
CT: control target
= control target key end

     0   :  { %10 = vsyncpa [#allocation3], 0  ;;  %s1881_s0 = inlined_call_operand.vmem [shape: f32[128,128], index: 0, kind: input, shape index: {}]   ;;  %s1882_s1 = inlined_call_operand.vmem [shape: f32[128,64], index: 1, kind: input, shape index: {}]   ;;  %s1883_s2 = inlined_call_operand.vmem [shape: f32[1,64], index: 2, kind: input, shape index: {}]   ;;  %s1884_s3 = inlined_call_operand.vmem [shape: f32[64,128], index: 3, kind: input, shape index: {}]   ;;  %s1885_s4 = inlined_call_operand.vmem [shape: f32[3,128], index: 4, kind: input, shape index: {}]   ;;  %s1886_s5 = inlined_call_operand.hbm [shape: f32[128,128], index: 5, kind: output, shape index: {}]  }
   0x1   :  { %12 = vsyncpa [#allocation3 + $0x1], 0  ;;  %s1510_s18 = smov 0   ;;  %s1512_s19 = smov 0  }
   0x2   :  { %s1514_s20 = smov 0   ;;  %s1516_s21 = smov 0  }
   0x3   :  { %s1518_s22 = smov 0   ;;  %s1520_s23 = smov 0  }
   0x4 LB: > { %s1018_s24 = sadd.s32 4294967295, %s1475_s23   ;;  %s1019_s25 = sadd.s32 4294967294, %s1475_s23   ;;  %s1475_s23 = sphi %s1520_s23, %s18_s23   ;;  %s1471_s22 = sphi %s1518_s22, %s1893_s22   ;;  %s1467_s21 = sphi %s1516_s21, %s1892_s21   ;;  %s1463_s20 = sphi %s1514_s20, %s1891_s20   ;;  %s1459_s19 = sphi %s1512_s19, %s1890_s19   ;;  %s1455_s18 = sphi %s1510_s18, %s1889_s18  }
   0x5   : > { %s30_s26 = sadd.s32 1, %s1471_s22  ;;  %s162_s27 = sadd.s32 1, %s1463_s20 }
   0x6   : > { %p32_p0 = scmp.ge.s32.totalorder %s30_s26, 2  ;;  %p172_p1 = scmp.ne.s32.totalorder %s1463_s20, %s1459_s19 }
   0x7   : > { %p173_p2 = scmp.eq.s32.totalorder %s1018_s24, 1  ;;  %p178_p3 = scmp.ne.s32.totalorder %s1459_s19, %s1455_s18 }
   0x8   : > { %s1895_s26 = smov (%p32_p0, %s30_s26), 0  ;;  %p179_p5 = scmp.eq.s32.totalorder %s1019_s25, 1 }
   0x9   : > { %p1550_p4 = por %p173_p2, %p172_p1  ;;  %s159_s29 = ssub.s32 %s1471_s22, %s1895_s26 }
   0xa   : > { %p1025_p6 = scmp.ge.s32.totalorder %s1475_s23, 1  ;;  %p160_p7 = scmp.eq.s32.totalorder %s159_s29, 0 }
   0xb   : > { %p1557_p8 = por %p179_p5, %p178_p3  ;;  %p231_p9 = scmp.lt.s32.totalorder %s1475_s23, 3 }
   0xc   : > { %s1563_s6 = scalar_select %p160_p7, %s1463_s20, %s162_s27  }
   0xd   : > { %p232_p10 = pnand %p1025_p6, %p231_p9 }
   0xe   : > { %v297_v0 = vld [vmem:[%s1882_s1] sm:$0xff] (!%p232_p10)  ;;  %v298_v1 = vld [vmem:[%s1882_s1 + $0x8] sm:$0xff] (!%p232_p10)  ;;  %v299_v2 = vld [vmem:[%s1882_s1 + $0x10] sm:$0xff] (!%p232_p10)  ;;  %s1027_s13 = sshll.u32 (!%p232_p10), %s1467_s21, 3  ;;  %vm416_vm0 = vcmask (!%p232_p10), 523264   ;;  %v518_v57 = vlaneseq (!%p232_p10)  ;;  %s1043_s8 = sshll.u32 (!%p232_p10), %s1467_s21, 10 }
   0xf   : > { %235 = sbr.rel (%p232_p10) target bundleno = 1066 (0x42a), region = 40  ;;  %v1575_v3 = vpack.c.bf16 (!%p232_p10), %v298_v1, %v297_v0  ;;  %v300_v4 = vld [vmem:[%s1882_s1 + $0x18] sm:$0xff] (!%p232_p10)  ;;  %p272_p11 = scmp.lt.s32.totalorder (!%p232_p10), %s1027_s13, 15  ;;  %v301_v6 = vld [vmem:[%s1882_s1 + $0x20] sm:$0xff] (!%p232_p10)  ;;  %v302_v7 = vld [vmem:[%s1882_s1 + $0x28] sm:$0xff] (!%p232_p10) }
  0x10   : > { %v1580_v5 = vpack.c.bf16 (!%p232_p10), %v300_v4, %v299_v2  ;;  %v1591_v8 = vpack.c.bf16 (!%p232_p10), %v302_v7, %v301_v6  ;;  %v303_v9 = vld [vmem:[%s1882_s1 + $0x30] sm:$0xff] (!%p232_p10)  ;;  %v408_v10 = vld [vmem:[%s1884_s3] sm:$0xff] (!%p232_p10)  ;;  %v409_v11 = vld [vmem:[%s1884_s3 + $0x8] sm:$0xff] (!%p232_p10)  ;;  %v519_v58 = vshrl.u32 (!%p232_p10), %v518_v57, 7  ;;  %s1826_s12 = scalar_lea.hbm (!%p232_p10), %s1886_s5, %s1043_s8  ;;  %s1477_s15 = smov (!%p232_p10), [#allocation2]  }
  0x11   : > { %1229 = vmatprep.subr.bf16.mxu0 (!%p232_p10), %v1575_v3  ;;  %v304_v12 = vld [vmem:[%s1882_s1 + $0x38] sm:$0xff] (!%p232_p10)  ;;  %v1260_v13 = vpack.c.bf16 (!%p232_p10), %v409_v11, %v408_v10  ;;  %v410_v14 = vld [vmem:[%s1884_s3 + $0x10] sm:$0xff] (!%p232_p10)  ;;  %v412_v18 = vld [vmem:[%s1884_s3 + $0x20] sm:$0xff] (!%p232_p10)  ;;  %s1401_s16 = sshll.u32 (!%p232_p10), %s1477_s15, 4  ;;  %s1402_s16 = int_to_ptr.vmem [resolvable:$false] %s1401_s16 }
  0x12   : > { %1231 = vmatpush3.bf16.msra.mxu0 (!%p232_p10), %v1575_v3  ;;  %v411_v15 = vld [vmem:[%s1884_s3 + $0x18] sm:$0xff] (!%p232_p10)  ;;  %v413_v19 = vld [vmem:[%s1884_s3 + $0x28] sm:$0xff] (!%p232_p10)  ;;  %v1628_v20 = vpack.c.bf16 (!%p232_p10), %v304_v12, %v303_v9  ;;  %v305_v21 = vld [vmem:[%s1882_s1 + $0x40] sm:$0xff] (!%p232_p10)  ;;  %v584_v59 = vsub.s32 (!%p232_p10), 1, %v519_v58  ;;  %v592_v60 = vsub.s32 (!%p232_p10), 2, %v519_v58  ;;  %v520_v0 = vsub.s32 (!%p232_p10), 0, %v519_v58 }
  0x13   : > { %1233 = vmatprep.subr.bf16.mxu0 (!%p232_p10), %v1580_v5  ;;  %v1264_v17 = vpack.c.bf16 (!%p232_p10), %v411_v15, %v410_v14  ;;  %1261 = vmatprep.subr.bf16.mxu1 (!%p232_p10), %v1260_v13  ;;  %v306_v22 = vld [vmem:[%s1882_s1 + $0x48] sm:$0xff] (!%p232_p10)  ;;  %v1268_v23 = vpack.c.bf16 (!%p232_p10), %v413_v19, %v412_v18  ;;  %v307_v25 = vld [vmem:[%s1882_s1 + $0x50] sm:$0xff] (!%p232_p10)  ;;  %v308_v26 = vld [vmem:[%s1882_s1 + $0x58] sm:$0xff] (!%p232_p10) }
  0x14   : > { %1263 = vmatpush3.bf16.msra.mxu1 (!%p232_p10), %v1260_v13  ;;  %v1638_v24 = vpack.c.bf16 (!%p232_p10), %v306_v22, %v305_v21  ;;  %v1648_v27 = vpack.c.bf16 (!%p232_p10), %v308_v26, %v307_v25  ;;  %v309_v28 = vld [vmem:[%s1882_s1 + $0x60] sm:$0xff] (!%p232_p10)  ;;  %v310_v29 = vld [vmem:[%s1882_s1 + $0x68] sm:$0xff] (!%p232_p10)  ;;  %v311_v31 = vld [vmem:[%s1882_s1 + $0x70] sm:$0xff] (!%p232_p10) }
  0x15   : > { %1265 = vmatprep.subr.bf16.mxu1 (!%p232_p10), %v1264_v17  ;;  %v1252_v30 = vpack.c.bf16 (!%p232_p10), %v310_v29, %v309_v28  ;;  %v312_v32 = vld [vmem:[%s1882_s1 + $0x78] sm:$0xff] (!%p232_p10)  ;;  %v414_v37 = vld [vmem:[%s1884_s3 + $0x30] sm:$0xff] (!%p232_p10)  ;;  %v1687_v40 = vld [vmem:[%s1883_s2] ss:$0 sm:$0xff] (!%p232_p10) }
  0x16   : > { %s1897_s13 = smov (!%p272_p11, %s1027_s13), 15  ;;  %1235 = vmatpush3.bf16.msra.mxu0 %v1580_v5  ;;  %v1256_v33 = vpack.c.bf16 %v312_v32, %v311_v31  ;;  %v415_v38 = vld [vmem:[%s1884_s3 + $0x38] sm:$0xff]  ;;  %v291_v61 = vld [vmem:[%s1885_s4] sm:$0x7] }
  0x17   : > { %s1028_s7 = sshll.u32 %s1897_s13, 3  ;;  %1237 = vmatprep.subr.bf16.mxu0 %v1591_v8  ;;  %v1272_v39 = vpack.c.bf16 %v415_v38, %v414_v37  ;;  %v1718_v62 = vrot.slane %v291_v61, %v584_v59  ;;  %v1720_v63 = vrot.slane %v291_v61, %v592_v60  ;;  %v521_v1 = vrot.slane %v291_v61, %v520_v0  ;;  %s1403_s13 = scalar_lea.vmem %s1402_s16, 2048 }
  0x18   : > { %s1608_s17 = scalar_lea.vmem %s1881_s0, %s1028_s7  ;;  %1267 = vmatpush3.bf16.msra.mxu1 %v1264_v17 }
  0x19   : > { %v1617_v16 = vld [vmem:[%s1608_s17] sm:$0xff]  ;;  %1269 = vmatprep.subr.bf16.mxu1 %v1268_v23  ;;  %v1666_v34 = vld [vmem:[%s1608_s17 + $0x8] sm:$0xff]  ;;  %v1669_v35 = vld [vmem:[%s1608_s17 + $0x10] sm:$0xff] }
  0x1a   : > { %1140 = vmatprep.mubr.f32.mxu0 %v1617_v16  ;;  %1239 = vmatpush3.bf16.msra.mxu0 %v1591_v8  ;;  %v1674_v36 = vld [vmem:[%s1608_s17 + $0x18] sm:$0xff]  ;;  %v1698_v53 = vld [vmem:[%s1608_s17 + $0x20] sm:$0xff]  ;;  %v603_v54 = vld [vmem:[%s1608_s17 + $0x28] sm:$0xff] }
  0x1b   : > { %1241 = vmatprep.subr.bf16.mxu0 %v1628_v20  ;;  %v604_v55 = vld [vmem:[%s1608_s17 + $0x30] sm:$0xff]  ;;  %v605_v56 = vld [vmem:[%s1608_s17 + $0x38] sm:$0xff]  ;;  %s268_s17 = sand.u32 1, %s1459_s19  }
  0x1c   : > { %1271 = vmatpush3.bf16.msra.mxu1 %v1268_v23  ;;  %s1026_s29 = sshll.u32 %s268_s17, 6  ;;  %s1835_s21 = scalar_lea.sflag [#allocation3], %s268_s17 }
  0x1d   : > { %1273 = vmatprep.subr.bf16.mxu1 %v1272_v39  ;;  %s1790_s7 = scalar_lea.vmem [#allocation2], %s1026_s29 }
  0x1e   : > { %1243 = vmatpush3.bf16.msra.mxu0 %v1628_v20  ;;  %s906_s9 = sshll.u32 %s1790_s7, 4  ;;  %s1828_s9 = int_to_ptr.vmem [resolvable:$true] %s906_s9 }
  0x1f   : > { %1245 = vmatprep.subr.bf16.mxu0 %v1638_v24  ;;  %s1397_s14 = scalar_lea.vmem %s1828_s9, 1024  ;;  %p1404_p1 = scmp.lt.s32.totalorder %s1828_s9, %s1402_s16 }
  0x20   : > { %1275 = vmatpush3.bf16.msra.mxu1 %v1272_v39  ;;  %p1398_p12 = scmp.ne.s32.totalorder %s1828_s9, %s1397_s14  ;;  %p1405_p2 = scmp.lt.s32.totalorder %s1403_s13, %s1397_s14 }
  0x21   : > { %1277 = vmatprep.subr.bf16.mxu1 %v1575_v3 }
  0x22   : > { %1247 = vmatpush3.bf16.msra.mxu0 %v1638_v24  ;;  %p1399_p13 = pnand %p1398_p12, %p1550_p4  ;;  %p1406_p3 = por %p1405_p2, %p1404_p1 }
  0x23   : > { %1249 = vmatprep.subr.bf16.mxu0 %v1648_v27 }
  0x24   : > { %p1400_p0 = pneg %p1399_p13 }
  0x26   : > { %1251 = vmatpush3.bf16.msra.mxu0 %v1648_v27  ;;  %p1407_p5 = pnand %p1406_p3, %p1400_p0 }
  0x27   : > { %1253 = vmatprep.subr.bf16.mxu0 %v1252_v30 }
  0x2a   : > { %1255 = vmatpush3.bf16.msra.mxu0 %v1252_v30 }
  0x2b   : > { %1257 = vmatprep.subr.bf16.mxu0 %v1256_v33 }
  0x2e   : > { %1259 = vmatpush3.bf16.msra.mxu0 %v1256_v33 }
  0x2f   : > { %1309 = vmatprep.subr.bf16.mxu0 %v1260_v13 }
  0x31   : > { %1141 = vmatmul.mubr.f32.vlgmr.msra.gmra.mrb[0].mxu0 %v1666_v34 }
  0x32   : > { %1143 = vmatprep.mubr.f32.mxu0 %v1669_v35  ;;  %1311 = vmatpush3.bf16.msra.mxu0 %v1260_v13 }
  0x33   : > { %1313 = vmatprep.subr.bf16.mxu0 %v1264_v17 }
  0x35   : > { %1144 = vmatmul.mubr.f32.gmra.mrb[2].mxu0 %v1674_v36 }
  0x36   : > { %1315 = vmatpush3.bf16.msra.mxu0 %v1264_v17 }
  0x37   : > { %1317 = vmatprep.subr.bf16.mxu0 %v1268_v23 }
  0x3a   : > { %1319 = vmatpush3.bf16.msra.mxu0 %v1268_v23 }
  0x3b   : > { %1321 = vmatprep.subr.bf16.mxu0 %v1272_v39 }
  0x3e   : > { %1323 = vmatpush3.bf16.msra.mxu0 %v1272_v39 }
 0x104   : > { %v1142_v41 = vpop.f32.mrb[0].mxu0 }
 0x105   : > { %v391_v42 = vadd.f32 %v1142_v41, %v1687_v40  ;;  %v385_v43 = vpop.f32.mrb[1].mxu0 }
 0x106   : > { %v386_v44 = vadd.f32 %v1687_v40, %v385_v43 }
 0x107   : > { %v405_v47 = vmax.f32 %v391_v42, 0.0 }
 0x108   : > { %v404_v45 = vmax.f32 %v386_v44, 0.0  ;;  %v1145_v46 = vpop.f32.mrb[2].mxu0 }
 0x109   : > { %v401_v48 = vadd.f32 %v1145_v46, %v1687_v40  ;;  %v395_v49 = vpop.f32.mrb[3].mxu0 }
 0x10a   : > { %v396_v50 = vadd.f32 %v1687_v40, %v395_v49  ;;  %1162 = vmatprep.mubr.msk.f32.mxu1 %vm416_vm0, %v404_v45 }
 0x10b   : > { %v407_v51 = vmax.f32 %v401_v48, 0.0  ;;  %1163 = vmatmul.mubr.msk.f32.vlgmr.msra.gmra.mrb[0].mxu1 %vm416_vm0, %v405_v47 }
 0x10c   : > { %v406_v52 = vmax.f32 %v396_v50, 0.0  ;;  %1279 = vmatpush3.bf16.msra.mxu1 %v1575_v3 }
 0x10d   : > { %1281 = vmatprep.subr.bf16.mxu1 %v1580_v5 }
 0x10e   : > { %1165 = vmatprep.mubr.msk.f32.mxu1 %vm416_vm0, %v406_v52 }
 0x10f   : > { %1166 = vmatmul.mubr.msk.f32.gmra.mrb[2].mxu1 %vm416_vm0, %v407_v51 }
 0x110   : > { %1283 = vmatpush3.bf16.msra.mxu1 %v1580_v5  ;;  %1200 = vmatprep.mubr.f32.mxu1 %v1698_v53 }
 0x111   : > { %1285 = vmatprep.subr.bf16.mxu1 %v1591_v8 }
 0x114   : > { %1287 = vmatpush3.bf16.msra.mxu1 %v1591_v8 }
 0x115   : > { %1289 = vmatprep.subr.bf16.mxu1 %v1628_v20 }
 0x118   : > { %1291 = vmatpush3.bf16.msra.mxu1 %v1628_v20 }
 0x119   : > { %1293 = vmatprep.subr.bf16.mxu1 %v1638_v24 }
 0x11c   : > { %1295 = vmatpush3.bf16.msra.mxu1 %v1638_v24 }
 0x11d   : > { %1297 = vmatprep.subr.bf16.mxu1 %v1648_v27 }
 0x120   : > { %1299 = vmatpush3.bf16.msra.mxu1 %v1648_v27 }
 0x121   : > { %1301 = vmatprep.subr.bf16.mxu1 %v1252_v30 }
 0x124   : > { %1303 = vmatpush3.bf16.msra.mxu1 %v1252_v30 }
 0x125   : > { %1305 = vmatprep.subr.bf16.mxu1 %v1256_v33 }
 0x128   : > { %1307 = vmatpush3.bf16.msra.mxu1 %v1256_v33 }
 0x12b   : > { %1201 = vmatmul.mubr.f32.vlgmr.msra.gmra.mrb[4].mxu1 %v603_v54 }
 0x12c   : > { %1203 = vmatprep.mubr.f32.mxu1 %v604_v55 }
 0x12f   : > { %1204 = vmatmul.mubr.f32.gmra.mrb[6].mxu1 %v605_v56 }
 0x1de   : > { %v1164_v2 = vpop.f32.mrb[0].mxu1 }
 0x1df   : > { %v515_v3 = vadd.f32 %v1164_v2, %v1666_v34  ;;  %v495_v4 = vpop.f32.mrb[1].mxu1 }
 0x1e0   : > { %v514_v5 = vadd.f32 %v495_v4, %v1617_v16 }
 0x1e1   : > { %v523_v6 = vadd.f32 %v521_v1, %v515_v3 }
 0x1e2   : > { %v1167_v7 = vpop.f32.mrb[2].mxu1  ;;  %v522_v11 = vadd.f32 %v521_v1, %v514_v5 }
 0x1e3   : > { %v517_v8 = vadd.f32 %v1167_v7, %v1674_v36  ;;  %528 = vadd.xlane.f32.xlu0 %v523_v6  ;;  %v505_v9 = vpop.f32.mrb[3].mxu1 }
 0x1e4   : > { %v516_v10 = vadd.f32 %v505_v9, %v1669_v35 }
 0x1e5   : > { %v525_v12 = vadd.f32 %v521_v1, %v517_v8 }
 0x1e6   : > { %v524_v13 = vadd.f32 %v521_v1, %v516_v10 }
 0x1e7   : > { %526 = vadd.xlane.f32.xlu0 %v522_v11  ;;  %532 = vadd.xlane.f32.xlu1 %v525_v12 }
 0x1eb   : > { %530 = vadd.xlane.f32.xlu1 %v524_v13 }
 0x1fe   : > { %v1202_v14 = vpop.f32.mrb[4].mxu1 }
 0x1ff   : > { %v694_v15 = vadd.f32 %v1202_v14, %v1687_v40  ;;  %v688_v17 = vpop.f32.mrb[5].mxu1 }
 0x200   : > { %v689_v16 = vadd.f32 %v1687_v40, %v688_v17 }
 0x201   : > { %v708_v20 = vmax.f32 %v694_v15, 0.0 }
 0x202   : > { %v707_v18 = vmax.f32 %v689_v16, 0.0  ;;  %v1205_v19 = vpop.f32.mrb[6].mxu1 }
 0x203   : > { %v704_v21 = vadd.f32 %v1205_v19, %v1687_v40  ;;  %v698_v22 = vpop.f32.mrb[7].mxu1 }
 0x204   : > { %v699_v23 = vadd.f32 %v1687_v40, %v698_v22  ;;  %1222 = vmatprep.mubr.msk.f32.mxu0 %vm416_vm0, %v707_v18 }
 0x205   : > { %1223 = vmatmul.mubr.msk.f32.vlgmr.msra.gmra.mrb[4].mxu0 %vm416_vm0, %v708_v20  ;;  %v710_v25 = vmax.f32 %v704_v21, 0.0 }
 0x206   : > { %v709_v24 = vmax.f32 %v699_v23, 0.0 }
 0x208   : > { %1225 = vmatprep.mubr.msk.f32.mxu0 %vm416_vm0, %v709_v24 }
 0x209   : > { %1226 = vmatmul.mubr.msk.f32.gmra.mrb[6].mxu0 %vm416_vm0, %v710_v25 }
 0x270   : > { %v529_v26 = vpop.xlane.xlu0 %528 }
 0x271   : > { %v535_v33 = vmul.f32 0.03125, %v529_v26 }
 0x273   : > { %v1735_v44 = vsub.f32 %v523_v6, %v535_v33  ;;  %v555_v59 = vmul.f32 96.0, %v535_v33 }
 0x274   : > { %v533_v27 = vpop.xlane.xlu1 %532  ;;  %v527_v29 = vpop.xlane.xlu0 %526 }
 0x275   : > { %v534_v35 = vmul.f32 0.03125, %v527_v29  ;;  %v537_v42 = vmul.f32 0.03125, %v533_v27  ;;  %v543_v48 = vmul.f32 %v1735_v44, %v1735_v44  ;;  %v559_v6 = vmul.f32 %v555_v59, %v535_v33 }
 0x277   : > { %v1737_v47 = vsub.f32 %v522_v11, %v534_v35  ;;  %v1741_v49 = vsub.f32 %v525_v12, %v537_v42  ;;  %v554_v0 = vmul.f32 96.0, %v534_v35  ;;  %v557_v8 = vmul.f32 96.0, %v537_v42 }
 0x278   : > { %v531_v38 = vpop.xlane.xlu1 %530 }
 0x279   : > { %v536_v45 = vmul.f32 0.03125, %v531_v38  ;;  %v542_v50 = vmul.f32 %v1737_v47, %v1737_v47  ;;  %v545_v52 = vmul.f32 %v1741_v49, %v1741_v49  ;;  %v558_v10 = vmul.f32 %v554_v0, %v534_v35 }
 0x27a   : > { %v561_v19 = vmul.f32 %v557_v8, %v537_v42 }
 0x27b   : > { %v1745_v51 = vsub.f32 %v524_v13, %v536_v45  ;;  %v556_v12 = vmul.f32 96.0, %v536_v45 }
 0x27d   : > { %v560_v22 = vmul.f32 %v556_v12, %v536_v45 }
 0x2d8   : > { %v1224_v28 = vpop.f32.mrb[4].mxu0 }
 0x2d9   : > { %v817_v30 = vadd.f32 %v1224_v28, %v603_v54  ;;  %v797_v31 = vpop.f32.mrb[5].mxu0 }
 0x2da   : > { %v816_v32 = vadd.f32 %v797_v31, %v1698_v53  ;;  %v544_v53 = vmul.f32 %v1745_v51, %v1745_v51 }
 0x2db   : > { %v821_v34 = vadd.f32 %v817_v30, %v521_v1 }
 0x2dc   : > { %v1227_v36 = vpop.f32.mrb[6].mxu0  ;;  %v820_v37 = vadd.f32 %v816_v32, %v521_v1 }
 0x2dd   : > { %v819_v39 = vadd.f32 %v1227_v36, %v605_v56  ;;  %v807_v40 = vpop.f32.mrb[7].mxu0  ;;  %826 = vadd.xlane.f32.xlu1 %v821_v34 }
 0x2de   : > { %v818_v41 = vadd.f32 %v807_v40, %v604_v55  ;;  %824 = vadd.xlane.f32.xlu0 %v820_v37 }
 0x2df   : > { %v823_v43 = vadd.f32 %v819_v39, %v521_v1 }
 0x2e0   : > { %v822_v46 = vadd.f32 %v818_v41, %v521_v1 }
 0x2e1   : > { %830 = vadd.xlane.f32.xlu1 %v823_v43 }
 0x2e2   : > { %828 = vadd.xlane.f32.xlu0 %v822_v46 }
 0x2e5   : > { %548 = vadd.xlane.f32.xlu1 %v543_v48 }
 0x2e6   : > { %546 = vadd.xlane.f32.xlu0 %v542_v50 }
 0x2e9   : > { %552 = vadd.xlane.f32.xlu1 %v545_v52 }
 0x2ea   : > { %550 = vadd.xlane.f32.xlu0 %v544_v53 }
 0x36a   : > { %v827_v54 = vpop.xlane.xlu1 %826 }
 0x36b   : > { %v1751_v55 = vmul.f32 0.03125, %v827_v54  ;;  %v825_v56 = vpop.xlane.xlu0 %824 }
 0x36c   : > { %v1753_v57 = vmul.f32 0.03125, %v825_v56 }
 0x36d   : > { %v1756_v58 = vsub.f32 %v821_v34, %v1751_v55  ;;  %v853_v48 = vmul.f32 96.0, %v1751_v55 }
 0x36e   : > { %v831_v60 = vpop.xlane.xlu1 %830  ;;  %v1759_v61 = vsub.f32 %v820_v37, %v1753_v57 }
 0x36f   : > { %v1761_v1 = vmul.f32 0.03125, %v831_v60  ;;  %v829_v2 = vpop.xlane.xlu0 %828  ;;  %v841_v3 = vmul.f32 %v1756_v58, %v1756_v58  ;;  %v857_v50 = vmul.f32 %v853_v48, %v1751_v55 }
 0x370   : > { %v1765_v4 = vmul.f32 0.03125, %v829_v2  ;;  %v840_v5 = vmul.f32 %v1759_v61, %v1759_v61 }
 0x371   : > { %846 = vadd.xlane.f32.xlu1 %v841_v3  ;;  %v1770_v7 = vsub.f32 %v823_v43, %v1761_v1 }
 0x372   : > { %844 = vadd.xlane.f32.xlu0 %v840_v5  ;;  %v549_v9 = vpop.xlane.xlu1 %548  ;;  %v1773_v11 = vsub.f32 %v822_v46, %v1765_v4  ;;  %v854_v54 = vmul.f32 96.0, %v1765_v4 }
 0x373   : > { %v563_v13 = vsub.f32 %v549_v9, %v559_v6  ;;  %v547_v14 = vpop.xlane.xlu0 %546  ;;  %v843_v15 = vmul.f32 %v1770_v7, %v1770_v7 }
 0x374   : > { %v562_v17 = vsub.f32 %v547_v14, %v558_v10  ;;  %v842_v16 = vmul.f32 %v1773_v11, %v1773_v11  ;;  %v858_v6 = vmul.f32 %v854_v54, %v1765_v4 }
 0x375   : > { %v567_v18 = vmul.f32 0.03125, %v563_v13  ;;  %850 = vadd.xlane.f32.xlu1 %v843_v15 }
 0x376   : > { %v566_v20 = vmul.f32 0.03125, %v562_v17  ;;  %848 = vadd.xlane.f32.xlu0 %v842_v16  ;;  %v553_v21 = vpop.xlane.xlu1 %552 }
 0x377   : > { %v571_v23 = vadd.f32 1e-05, %v567_v18  ;;  %v565_v24 = vsub.f32 %v553_v21, %v561_v19  ;;  %v551_v25 = vpop.xlane.xlu0 %550 }
 0x378   : > { %v570_v26 = vadd.f32 1e-05, %v566_v20  ;;  %v564_v27 = vsub.f32 %v551_v25, %v560_v22 }
 0x379   : > { %1381 = vrsqrt.f32 %v571_v23  ;;  %v569_v28 = vmul.f32 0.03125, %v565_v24 }
 0x37a   : > { %1383 = vrsqrt.f32 %v570_v26  ;;  %v568_v29 = vmul.f32 0.03125, %v564_v27 }
 0x37b   : > { %v573_v30 = vadd.f32 1e-05, %v569_v28 }
 0x37c   : > { %v572_v31 = vadd.f32 1e-05, %v568_v29 }
 0x37d   : > { %1385 = vrsqrt.f32 %v573_v30 }
 0x37e   : > { %1387 = vrsqrt.f32 %v572_v31 }
 0x383   : > { %v1382_v32 = vpop.eup %1381 }
 0x384   : > { %v1384_v33 = vpop.eup %1383  ;;  %v579_v34 = vmul.f32 %v1382_v32, %v1735_v44 }
 0x385   : > { %v578_v35 = vmul.f32 %v1384_v33, %v1737_v47 }
 0x386   : > { %v587_v36 = vmul.f32 %v1718_v62, %v579_v34 }
 0x387   : > { %v1386_v37 = vpop.eup %1385  ;;  %v586_v38 = vmul.f32 %v1718_v62, %v578_v35 }
 0x388   : > { %v1388_v39 = vpop.eup %1387  ;;  %v595_v40 = vadd.f32 %v1720_v63, %v587_v36  ;;  %v581_v41 = vmul.f32 %v1386_v37, %v1741_v49  ;;  %v852_v49 = vmul.f32 96.0, %v1753_v57 }
 0x389   : > { %v594_v42 = vadd.f32 %v1720_v63, %v586_v38  ;;  %v580_v43 = vmul.f32 %v1388_v39, %v1745_v51  ;;  %v855_v51 = vmul.f32 96.0, %v1761_v1 }
 0x38a   : > { %599 = vst [vmem:[%s1790_s7 + $0x8] sm:$0xff] %v595_v40  ;;  %v589_v44 = vmul.f32 %v1718_v62, %v581_v41  ;;  %v856_v53 = vmul.f32 %v852_v49, %v1753_v57 }
 0x38b   : > { %598 = vst [vmem:[%s1790_s7] sm:$0xff] %v594_v42  ;;  %v588_v45 = vmul.f32 %v1718_v62, %v580_v43  ;;  %v859_v2 = vmul.f32 %v855_v51, %v1761_v1 }
 0x38c   : > { %v597_v46 = vadd.f32 %v1720_v63, %v589_v44 }
 0x38d   : > { %v596_v47 = vadd.f32 %v1720_v63, %v588_v45 }
 0x38e   : > { %601 = vst [vmem:[%s1790_s7 + $0x18] sm:$0xff] %v597_v46 }
 0x38f   : > { %600 = vst [vmem:[%s1790_s7 + $0x10] sm:$0xff] %v596_v47 }
 0x3fe   : > { %v847_v52 = vpop.xlane.xlu1 %846 }
 0x3ff   : > { %v861_v56 = vsub.f32 %v847_v52, %v857_v50  ;;  %v845_v59 = vpop.xlane.xlu0 %844 }
 0x400   : > { %v860_v60 = vsub.f32 %v845_v59, %v856_v53 }
 0x401   : > { %v865_v0 = vmul.f32 0.03125, %v861_v56 }
 0x402   : > { %v864_v3 = vmul.f32 0.03125, %v860_v60  ;;  %v851_v5 = vpop.xlane.xlu1 %850 }
 0x403   : > { %v869_v8 = vadd.f32 1e-05, %v865_v0  ;;  %v863_v9 = vsub.f32 %v851_v5, %v859_v2  ;;  %v849_v55 = vpop.xlane.xlu0 %848 }
 0x404   : > { %v868_v10 = vadd.f32 1e-05, %v864_v3  ;;  %v862_v12 = vsub.f32 %v849_v55, %v858_v6 }
 0x405   : > { %1389 = vrsqrt.f32 %v869_v8  ;;  %v867_v13 = vmul.f32 0.03125, %v863_v9 }
 0x406   : > { %1391 = vrsqrt.f32 %v868_v10  ;;  %v866_v57 = vmul.f32 0.03125, %v862_v12 }
 0x407   : > { %v871_v14 = vadd.f32 1e-05, %v867_v13 }
 0x408   : > { %v870_v15 = vadd.f32 1e-05, %v866_v57 }
 0x409   : > { %1393 = vrsqrt.f32 %v871_v14 }
 0x40a   : > { %1395 = vrsqrt.f32 %v870_v15 }
 0x40f   : > { %v1390_v1 = vpop.eup %1389 }
 0x410   : > { %v1392_v17 = vpop.eup %1391  ;;  %v877_v4 = vmul.f32 %v1390_v1, %v1756_v58 }
 0x411   : > { %v876_v16 = vmul.f32 %v1392_v17, %v1759_v61 }
 0x412   : > { %v881_v18 = vmul.f32 %v877_v4, %v1718_v62 }
 0x413   : > { %v1394_v19 = vpop.eup %1393  ;;  %v880_v20 = vmul.f32 %v876_v16, %v1718_v62 }
 0x414   : > { %v1396_v21 = vpop.eup %1395  ;;  %v885_v22 = vadd.f32 %v881_v18, %v1720_v63  ;;  %v879_v23 = vmul.f32 %v1394_v19, %v1770_v7 }
 0x415   : > { %v884_v24 = vadd.f32 %v880_v20, %v1720_v63  ;;  %v878_v25 = vmul.f32 %v1396_v21, %v1773_v11 }
 0x416   : > { %889 = vst [vmem:[%s1790_s7 + $0x28] sm:$0xff] %v885_v22  ;;  %v883_v58 = vmul.f32 %v879_v23, %v1718_v62 }
 0x417   : > { %888 = vst [vmem:[%s1790_s7 + $0x20] sm:$0xff] %v884_v24  ;;  %v882_v61 = vmul.f32 %v878_v25, %v1718_v62 }
 0x418   : > { %v887_v26 = vadd.f32 %v883_v58, %v1720_v63 }
 0x419   : > { %v886_v7 = vadd.f32 %v882_v61, %v1720_v63 }
 0x41a   : > { %891 = vst [vmem:[%s1790_s7 + $0x38] sm:$0xff] %v887_v26 }
 0x41b   : > { %890 = vst [vmem:[%s1790_s7 + $0x30] sm:$0xff] %v886_v7 }
 0x41c   : > { %1410 = shalt.err (!%p1407_p5)
}
 0x41d   : > { %s1411_s24 = scalar_lea.hbm %s1826_s12, 1024  ;;  %s1415_s17 = scalar_lea.hbm %s1886_s5, 2048 }
 0x41e   : > { %p1412_p6 = scmp.ne.s32.totalorder %s1826_s12, %s1411_s24  ;;  %p1416_p10 = scmp.lt.u32.totalorder %s1826_s12, %s1886_s5 }
 0x41f   : > { %p1417_p11 = scmp.lt.u32.totalorder %s1415_s17, %s1411_s24  ;;  %p1419_p13 = scmp.lt.u32.totalorder %s1411_s24, %s1826_s12 }
 0x420   : > { %p1413_p7 = pnand %p1412_p6, %p1550_p4 }
 0x421   : > { %p1418_p12 = por %p1417_p11, %p1416_p10 }
 0x422   : > { %p1414_p9 = pneg %p1413_p7 }
 0x423   : > { %p1420_p0 = por %p1419_p13, %p1418_p12 }
 0x425   : > { %p1421_p1 = pnand %p1420_p0, %p1414_p9 }
 0x427   : > { %1424 = shalt.err (!%p1421_p1)
}
 0x428   : > { %s1478_s8 = smov 128   ;;  %s1479_s10 = smov 8  }
 0x429   : > { %1324 = dma.vmem_to_hbm [thread:$0]  (%p1550_p4), %s1828_s9, 1024, %s1826_s12, %s1835_s21, %s1478_s8, %s1478_s8, %s1479_s10  }
 0x42a PF: > { %p1330_p2 = scmp.ge.s32.totalorder %s1475_s23, 2  ;;  %s921_s11 = sand.u32 1, %s1455_s18  }
 0x42b   : > { %s922_s14 = scalar_lea.sflag [#allocation3], %s921_s11 }
 0x42c   : > { %p1327_p3 = pnand %p1330_p2, %p1557_p8 }
 0x42e   : > { %1450 = dma.done.wait (!%p1327_p3), %s922_s14, 1024  }
 0x42f   : > { %1452 = vsyncadd (!%p1327_p3), %s922_s14, 4294966272  ;;  %s18_s23 = sadd.s32 1, %s1475_s23   ;;  %s1889_s18 = smov %s1459_s19 }
 0x430   : > { %p15_p5 = scmp.ge.s32.totalorder %s18_s23, 4   ;;  %s1890_s19 = smov %s1463_s20 }
 0x431   : > { %s1891_s20 = smov %s1563_s6  ;;  %s1892_s21 = smov %s1471_s22 }
 0x432   : > { %s1893_s22 = smov %s1895_s26  ;;  %17 = sbr.rel (!%p15_p5) target bundleno = 4 (0x4), region = 84 }
 0x439   :  { %927 = vsyncpa [#allocation3], 1 }
 0x43a   :  { %929 = vsyncpa [#allocation3 + $0x1], 1 }

// kernel: tpu_custom_call.1
= control target key start
LH: loop header
LB: loop body
LE: loop exit
PB: predicated region body
PF: predicated region fallthrough
CT: control target
= control target key end

     0   :  { %10 = vsyncpa [#allocation3], 0  ;;  %s1881_s0 = inlined_call_operand.vmem [shape: f32[128,128], index: 0, kind: input, shape index: {}]   ;;  %s1882_s1 = inlined_call_operand.vmem [shape: f32[128,64], index: 1, kind: input, shape index: {}]   ;;  %s1883_s2 = inlined_call_operand.vmem [shape: f32[1,64], index: 2, kind: input, shape index: {}]   ;;  %s1884_s3 = inlined_call_operand.vmem [shape: f32[64,128], index: 3, kind: input, shape index: {}]   ;;  %s1885_s4 = inlined_call_operand.vmem [shape: f32[3,128], index: 4, kind: input, shape index: {}]   ;;  %s1886_s5 = inlined_call_operand.hbm [shape: f32[128,128], index: 5, kind: output, shape index: {}]  }
   0x1   :  { %12 = vsyncpa [#allocation3 + $0x1], 0  ;;  %s1510_s18 = smov 0   ;;  %s1512_s19 = smov 0  }
   0x2   :  { %s1514_s20 = smov 0   ;;  %s1516_s21 = smov 0  }
   0x3   :  { %s1518_s22 = smov 0   ;;  %s1520_s23 = smov 0  }
   0x4 LB: > { %s1018_s24 = sadd.s32 4294967295, %s1475_s23   ;;  %s1019_s25 = sadd.s32 4294967294, %s1475_s23   ;;  %s1475_s23 = sphi %s1520_s23, %s18_s23   ;;  %s1471_s22 = sphi %s1518_s22, %s1893_s22   ;;  %s1467_s21 = sphi %s1516_s21, %s1892_s21   ;;  %s1463_s20 = sphi %s1514_s20, %s1891_s20   ;;  %s1459_s19 = sphi %s1512_s19, %s1890_s19   ;;  %s1455_s18 = sphi %s1510_s18, %s1889_s18  }
   0x5   : > { %s30_s26 = sadd.s32 1, %s1471_s22  ;;  %s162_s27 = sadd.s32 1, %s1463_s20 }
   0x6   : > { %p32_p0 = scmp.ge.s32.totalorder %s30_s26, 2  ;;  %p172_p1 = scmp.ne.s32.totalorder %s1463_s20, %s1459_s19 }
   0x7   : > { %p173_p2 = scmp.eq.s32.totalorder %s1018_s24, 1  ;;  %p178_p3 = scmp.ne.s32.totalorder %s1459_s19, %s1455_s18 }
   0x8   : > { %s1895_s26 = smov (%p32_p0, %s30_s26), 0  ;;  %p179_p5 = scmp.eq.s32.totalorder %s1019_s25, 1 }
   0x9   : > { %p1550_p4 = por %p173_p2, %p172_p1  ;;  %s159_s29 = ssub.s32 %s1471_s22, %s1895_s26 }
   0xa   : > { %p1025_p6 = scmp.ge.s32.totalorder %s1475_s23, 1  ;;  %p160_p7 = scmp.eq.s32.totalorder %s159_s29, 0 }
   0xb   : > { %p1557_p8 = por %p179_p5, %p178_p3  ;;  %p231_p9 = scmp.lt.s32.totalorder %s1475_s23, 3 }
   0xc   : > { %s1563_s6 = scalar_select %p160_p7, %s1463_s20, %s162_s27  }
   0xd   : > { %p232_p10 = pnand %p1025_p6, %p231_p9 }
   0xe   : > { %v297_v0 = vld [vmem:[%s1882_s1] sm:$0xff] (!%p232_p10)  ;;  %v298_v1 = vld [vmem:[%s1882_s1 + $0x8] sm:$0xff] (!%p232_p10)  ;;  %v299_v2 = vld [vmem:[%s1882_s1 + $0x10] sm:$0xff] (!%p232_p10)  ;;  %s1027_s13 = sshll.u32 (!%p232_p10), %s1467_s21, 3  ;;  %vm416_vm0 = vcmask (!%p232_p10), 523264   ;;  %v518_v57 = vlaneseq (!%p232_p10)  ;;  %s1043_s8 = sshll.u32 (!%p232_p10), %s1467_s21, 10 }
   0xf   : > { %235 = sbr.rel (%p232_p10) target bundleno = 1066 (0x42a), region = 40  ;;  %v1575_v3 = vpack.c.bf16 (!%p232_p10), %v298_v1, %v297_v0  ;;  %v300_v4 = vld [vmem:[%s1882_s1 + $0x18] sm:$0xff] (!%p232_p10)  ;;  %p272_p11 = scmp.lt.s32.totalorder (!%p232_p10), %s1027_s13, 15  ;;  %v301_v6 = vld [vmem:[%s1882_s1 + $0x20] sm:$0xff] (!%p232_p10)  ;;  %v302_v7 = vld [vmem:[%s1882_s1 + $0x28] sm:$0xff] (!%p232_p10) }
  0x10   : > { %v1580_v5 = vpack.c.bf16 (!%p232_p10), %v300_v4, %v299_v2  ;;  %v1591_v8 = vpack.c.bf16 (!%p232_p10), %v302_v7, %v301_v6  ;;  %v303_v9 = vld [vmem:[%s1882_s1 + $0x30] sm:$0xff] (!%p232_p10)  ;;  %v408_v10 = vld [vmem:[%s1884_s3] sm:$0xff] (!%p232_p10)  ;;  %v409_v11 = vld [vmem:[%s1884_s3 + $0x8] sm:$0xff] (!%p232_p10)  ;;  %v519_v58 = vshrl.u32 (!%p232_p10), %v518_v57, 7  ;;  %s1826_s12 = scalar_lea.hbm (!%p232_p10), %s1886_s5, %s1043_s8  ;;  %s1477_s15 = smov (!%p232_p10), [#allocation2]  }
  0x11   : > { %1229 = vmatprep.subr.bf16.mxu0 (!%p232_p10), %v1575_v3  ;;  %v304_v12 = vld [vmem:[%s1882_s1 + $0x38] sm:$0xff] (!%p232_p10)  ;;  %v1260_v13 = vpack.c.bf16 (!%p232_p10), %v409_v11, %v408_v10  ;;  %v410_v14 = vld [vmem:[%s1884_s3 + $0x10] sm:$0xff] (!%p232_p10)  ;;  %v412_v18 = vld [vmem:[%s1884_s3 + $0x20] sm:$0xff] (!%p232_p10)  ;;  %s1401_s16 = sshll.u32 (!%p232_p10), %s1477_s15, 4  ;;  %s1402_s16 = int_to_ptr.vmem [resolvable:$false] %s1401_s16 }
  0x12   : > { %1231 = vmatpush3.bf16.msra.mxu0 (!%p232_p10), %v1575_v3  ;;  %v411_v15 = vld [vmem:[%s1884_s3 + $0x18] sm:$0xff] (!%p232_p10)  ;;  %v413_v19 = vld [vmem:[%s1884_s3 + $0x28] sm:$0xff] (!%p232_p10)  ;;  %v1628_v20 = vpack.c.bf16 (!%p232_p10), %v304_v12, %v303_v9  ;;  %v305_v21 = vld [vmem:[%s1882_s1 + $0x40] sm:$0xff] (!%p232_p10)  ;;  %v584_v59 = vsub.s32 (!%p232_p10), 1, %v519_v58  ;;  %v592_v60 = vsub.s32 (!%p232_p10), 2, %v519_v58  ;;  %v520_v0 = vsub.s32 (!%p232_p10), 0, %v519_v58 }
  0x13   : > { %1233 = vmatprep.subr.bf16.mxu0 (!%p232_p10), %v1580_v5  ;;  %v1264_v17 = vpack.c.bf16 (!%p232_p10), %v411_v15, %v410_v14  ;;  %1261 = vmatprep.subr.bf16.mxu1 (!%p232_p10), %v1260_v13  ;;  %v306_v22 = vld [vmem:[%s1882_s1 + $0x48] sm:$0xff] (!%p232_p10)  ;;  %v1268_v23 = vpack.c.bf16 (!%p232_p10), %v413_v19, %v412_v18  ;;  %v307_v25 = vld [vmem:[%s1882_s1 + $0x50] sm:$0xff] (!%p232_p10)  ;;  %v308_v26 = vld [vmem:[%s1882_s1 + $0x58] sm:$0xff] (!%p232_p10) }
  0x14   : > { %1263 = vmatpush3.bf16.msra.mxu1 (!%p232_p10), %v1260_v13  ;;  %v1638_v24 = vpack.c.bf16 (!%p232_p10), %v306_v22, %v305_v21  ;;  %v1648_v27 = vpack.c.bf16 (!%p232_p10), %v308_v26, %v307_v25  ;;  %v309_v28 = vld [vmem:[%s1882_s1 + $0x60] sm:$0xff] (!%p232_p10)  ;;  %v310_v29 = vld [vmem:[%s1882_s1 + $0x68] sm:$0xff] (!%p232_p10)  ;;  %v311_v31 = vld [vmem:[%s1882_s1 + $0x70] sm:$0xff] (!%p232_p10) }
  0x15   : > { %1265 = vmatprep.subr.bf16.mxu1 (!%p232_p10), %v1264_v17  ;;  %v1252_v30 = vpack.c.bf16 (!%p232_p10), %v310_v29, %v309_v28  ;;  %v312_v32 = vld [vmem:[%s1882_s1 + $0x78] sm:$0xff] (!%p232_p10)  ;;  %v414_v37 = vld [vmem:[%s1884_s3 + $0x30] sm:$0xff] (!%p232_p10)  ;;  %v1687_v40 = vld [vmem:[%s1883_s2] ss:$0 sm:$0xff] (!%p232_p10) }
  0x16   : > { %s1897_s13 = smov (!%p272_p11, %s1027_s13), 15  ;;  %1235 = vmatpush3.bf16.msra.mxu0 %v1580_v5  ;;  %v1256_v33 = vpack.c.bf16 %v312_v32, %v311_v31  ;;  %v415_v38 = vld [vmem:[%s1884_s3 + $0x38] sm:$0xff]  ;;  %v291_v61 = vld [vmem:[%s1885_s4] sm:$0x7] }
  0x17   : > { %s1028_s7 = sshll.u32 %s1897_s13, 3  ;;  %1237 = vmatprep.subr.bf16.mxu0 %v1591_v8  ;;  %v1272_v39 = vpack.c.bf16 %v415_v38, %v414_v37  ;;  %v1718_v62 = vrot.slane %v291_v61, %v584_v59  ;;  %v1720_v63 = vrot.slane %v291_v61, %v592_v60  ;;  %v521_v1 = vrot.slane %v291_v61, %v520_v0  ;;  %s1403_s13 = scalar_lea.vmem %s1402_s16, 2048 }
  0x18   : > { %s1608_s17 = scalar_lea.vmem %s1881_s0, %s1028_s7  ;;  %1267 = vmatpush3.bf16.msra.mxu1 %v1264_v17 }
  0x19   : > { %v1617_v16 = vld [vmem:[%s1608_s17] sm:$0xff]  ;;  %1269 = vmatprep.subr.bf16.mxu1 %v1268_v23  ;;  %v1666_v34 = vld [vmem:[%s1608_s17 + $0x8] sm:$0xff]  ;;  %v1669_v35 = vld [vmem:[%s1608_s17 + $0x10] sm:$0xff] }
  0x1a   : > { %1140 = vmatprep.mubr.f32.mxu0 %v1617_v16  ;;  %1239 = vmatpush3.bf16.msra.mxu0 %v1591_v8  ;;  %v1674_v36 = vld [vmem:[%s1608_s17 + $0x18] sm:$0xff]  ;;  %v1698_v53 = vld [vmem:[%s1608_s17 + $0x20] sm:$0xff]  ;;  %v603_v54 = vld [vmem:[%s1608_s17 + $0x28] sm:$0xff] }
  0x1b   : > { %1241 = vmatprep.subr.bf16.mxu0 %v1628_v20  ;;  %v604_v55 = vld [vmem:[%s1608_s17 + $0x30] sm:$0xff]  ;;  %v605_v56 = vld [vmem:[%s1608_s17 + $0x38] sm:$0xff]  ;;  %s268_s17 = sand.u32 1, %s1459_s19  }
  0x1c   : > { %1271 = vmatpush3.bf16.msra.mxu1 %v1268_v23  ;;  %s1026_s29 = sshll.u32 %s268_s17, 6  ;;  %s1835_s21 = scalar_lea.sflag [#allocation3], %s268_s17 }
  0x1d   : > { %1273 = vmatprep.subr.bf16.mxu1 %v1272_v39  ;;  %s1790_s7 = scalar_lea.vmem [#allocation2], %s1026_s29 }
  0x1e   : > { %1243 = vmatpush3.bf16.msra.mxu0 %v1628_v20  ;;  %s906_s9 = sshll.u32 %s1790_s7, 4  ;;  %s1828_s9 = int_to_ptr.vmem [resolvable:$true] %s906_s9 }
  0x1f   : > { %1245 = vmatprep.subr.bf16.mxu0 %v1638_v24  ;;  %s1397_s14 = scalar_lea.vmem %s1828_s9, 1024  ;;  %p1404_p1 = scmp.lt.s32.totalorder %s1828_s9, %s1402_s16 }
  0x20   : > { %1275 = vmatpush3.bf16.msra.mxu1 %v1272_v39  ;;  %p1398_p12 = scmp.ne.s32.totalorder %s1828_s9, %s1397_s14  ;;  %p1405_p2 = scmp.lt.s32.totalorder %s1403_s13, %s1397_s14 }
  0x21   : > { %1277 = vmatprep.subr.bf16.mxu1 %v1575_v3 }
  0x22   : > { %1247 = vmatpush3.bf16.msra.mxu0 %v1638_v24  ;;  %p1399_p13 = pnand %p1398_p12, %p1550_p4  ;;  %p1406_p3 = por %p1405_p2, %p1404_p1 }
  0x23   : > { %1249 = vmatprep.subr.bf16.mxu0 %v1648_v27 }
  0x24   : > { %p1400_p0 = pneg %p1399_p13 }
  0x26   : > { %1251 = vmatpush3.bf16.msra.mxu0 %v1648_v27  ;;  %p1407_p5 = pnand %p1406_p3, %p1400_p0 }
  0x27   : > { %1253 = vmatprep.subr.bf16.mxu0 %v1252_v30 }
  0x2a   : > { %1255 = vmatpush3.bf16.msra.mxu0 %v1252_v30 }
  0x2b   : > { %1257 = vmatprep.subr.bf16.mxu0 %v1256_v33 }
  0x2e   : > { %1259 = vmatpush3.bf16.msra.mxu0 %v1256_v33 }
  0x2f   : > { %1309 = vmatprep.subr.bf16.mxu0 %v1260_v13 }
  0x31   : > { %1141 = vmatmul.mubr.f32.vlgmr.msra.gmra.mrb[0].mxu0 %v1666_v34 }
  0x32   : > { %1143 = vmatprep.mubr.f32.mxu0 %v1669_v35  ;;  %1311 = vmatpush3.bf16.msra.mxu0 %v1260_v13 }
  0x33   : > { %1313 = vmatprep.subr.bf16.mxu0 %v1264_v17 }
  0x35   : > { %1144 = vmatmul.mubr.f32.gmra.mrb[2].mxu0 %v1674_v36 }
  0x36   : > { %1315 = vmatpush3.bf16.msra.mxu0 %v1264_v17 }
  0x37   : > { %1317 = vmatprep.subr.bf16.mxu0 %v1268_v23 }
  0x3a   : > { %1319 = vmatpush3.bf16.msra.mxu0 %v1268_v23 }
  0x3b   : > { %1321 = vmatprep.subr.bf16.mxu0 %v1272_v39 }
  0x3e   : > { %1323 = vmatpush3.bf16.msra.mxu0 %v1272_v39 }
 0x104   : > { %v1142_v41 = vpop.f32.mrb[0].mxu0 }
 0x105   : > { %v391_v42 = vadd.f32 %v1142_v41, %v1687_v40  ;;  %v385_v43 = vpop.f32.mrb[1].mxu0 }
 0x106   : > { %v386_v44 = vadd.f32 %v1687_v40, %v385_v43 }
 0x107   : > { %v405_v47 = vmax.f32 %v391_v42, 0.0 }
 0x108   : > { %v404_v45 = vmax.f32 %v386_v44, 0.0  ;;  %v1145_v46 = vpop.f32.mrb[2].mxu0 }
 0x109   : > { %v401_v48 = vadd.f32 %v1145_v46, %v1687_v40  ;;  %v395_v49 = vpop.f32.mrb[3].mxu0 }
 0x10a   : > { %v396_v50 = vadd.f32 %v1687_v40, %v395_v49  ;;  %1162 = vmatprep.mubr.msk.f32.mxu1 %vm416_vm0, %v404_v45 }
 0x10b   : > { %v407_v51 = vmax.f32 %v401_v48, 0.0  ;;  %1163 = vmatmul.mubr.msk.f32.vlgmr.msra.gmra.mrb[0].mxu1 %vm416_vm0, %v405_v47 }
 0x10c   : > { %v406_v52 = vmax.f32 %v396_v50, 0.0  ;;  %1279 = vmatpush3.bf16.msra.mxu1 %v1575_v3 }
 0x10d   : > { %1281 = vmatprep.subr.bf16.mxu1 %v1580_v5 }
 0x10e   : > { %1165 = vmatprep.mubr.msk.f32.mxu1 %vm416_vm0, %v406_v52 }
 0x10f   : > { %1166 = vmatmul.mubr.msk.f32.gmra.mrb[2].mxu1 %vm416_vm0, %v407_v51 }
 0x110   : > { %1283 = vmatpush3.bf16.msra.mxu1 %v1580_v5  ;;  %1200 = vmatprep.mubr.f32.mxu1 %v1698_v53 }
 0x111   : > { %1285 = vmatprep.subr.bf16.mxu1 %v1591_v8 }
 0x114   : > { %1287 = vmatpush3.bf16.msra.mxu1 %v1591_v8 }
 0x115   : > { %1289 = vmatprep.subr.bf16.mxu1 %v1628_v20 }
 0x118   : > { %1291 = vmatpush3.bf16.msra.mxu1 %v1628_v20 }
 0x119   : > { %1293 = vmatprep.subr.bf16.mxu1 %v1638_v24 }
 0x11c   : > { %1295 = vmatpush3.bf16.msra.mxu1 %v1638_v24 }
 0x11d   : > { %1297 = vmatprep.subr.bf16.mxu1 %v1648_v27 }
 0x120   : > { %1299 = vmatpush3.bf16.msra.mxu1 %v1648_v27 }
 0x121   : > { %1301 = vmatprep.subr.bf16.mxu1 %v1252_v30 }
 0x124   : > { %1303 = vmatpush3.bf16.msra.mxu1 %v1252_v30 }
 0x125   : > { %1305 = vmatprep.subr.bf16.mxu1 %v1256_v33 }
 0x128   : > { %1307 = vmatpush3.bf16.msra.mxu1 %v1256_v33 }
 0x12b   : > { %1201 = vmatmul.mubr.f32.vlgmr.msra.gmra.mrb[4].mxu1 %v603_v54 }
 0x12c   : > { %1203 = vmatprep.mubr.f32.mxu1 %v604_v55 }
 0x12f   : > { %1204 = vmatmul.mubr.f32.gmra.mrb[6].mxu1 %v605_v56 }
 0x1de   : > { %v1164_v2 = vpop.f32.mrb[0].mxu1 }
 0x1df   : > { %v515_v3 = vadd.f32 %v1164_v2, %v1666_v34  ;;  %v495_v4 = vpop.f32.mrb[1].mxu1 }
 0x1e0   : > { %v514_v5 = vadd.f32 %v495_v4, %v1617_v16 }
 0x1e1   : > { %v523_v6 = vadd.f32 %v521_v1, %v515_v3 }
 0x1e2   : > { %v1167_v7 = vpop.f32.mrb[2].mxu1  ;;  %v522_v11 = vadd.f32 %v521_v1, %v514_v5 }
 0x1e3   : > { %v517_v8 = vadd.f32 %v1167_v7, %v1674_v36  ;;  %528 = vadd.xlane.f32.xlu0 %v523_v6  ;;  %v505_v9 = vpop.f32.mrb[3].mxu1 }
 0x1e4   : > { %v516_v10 = vadd.f32 %v505_v9, %v1669_v35 }
 0x1e5   : > { %v525_v12 = vadd.f32 %v521_v1, %v517_v8 }
 0x1e6   : > { %v524_v13 = vadd.f32 %v521_v1, %v516_v10 }
 0x1e7   : > { %526 = vadd.xlane.f32.xlu0 %v522_v11  ;;  %532 = vadd.xlane.f32.xlu1 %v525_v12 }
 0x1eb   : > { %530 = vadd.xlane.f32.xlu1 %v524_v13 }
 0x1fe   : > { %v1202_v14 = vpop.f32.mrb[4].mxu1 }
 0x1ff   : > { %v694_v15 = vadd.f32 %v1202_v14, %v1687_v40  ;;  %v688_v17 = vpop.f32.mrb[5].mxu1 }
 0x200   : > { %v689_v16 = vadd.f32 %v1687_v40, %v688_v17 }
 0x201   : > { %v708_v20 = vmax.f32 %v694_v15, 0.0 }
 0x202   : > { %v707_v18 = vmax.f32 %v689_v16, 0.0  ;;  %v1205_v19 = vpop.f32.mrb[6].mxu1 }
 0x203   : > { %v704_v21 = vadd.f32 %v1205_v19, %v1687_v40  ;;  %v698_v22 = vpop.f32.mrb[7].mxu1 }
 0x204   : > { %v699_v23 = vadd.f32 %v1687_v40, %v698_v22  ;;  %1222 = vmatprep.mubr.msk.f32.mxu0 %vm416_vm0, %v707_v18 }
 0x205   : > { %1223 = vmatmul.mubr.msk.f32.vlgmr.msra.gmra.mrb[4].mxu0 %vm416_vm0, %v708_v20  ;;  %v710_v25 = vmax.f32 %v704_v21, 0.0 }
 0x206   : > { %v709_v24 = vmax.f32 %v699_v23, 0.0 }
 0x208   : > { %1225 = vmatprep.mubr.msk.f32.mxu0 %vm416_vm0, %v709_v24 }
 0x209   : > { %1226 = vmatmul.mubr.msk.f32.gmra.mrb[6].mxu0 %vm416_vm0, %v710_v25 }
 0x270   : > { %v529_v26 = vpop.xlane.xlu0 %528 }
 0x271   : > { %v535_v33 = vmul.f32 0.03125, %v529_v26 }
 0x273   : > { %v1735_v44 = vsub.f32 %v523_v6, %v535_v33  ;;  %v555_v59 = vmul.f32 96.0, %v535_v33 }
 0x274   : > { %v533_v27 = vpop.xlane.xlu1 %532  ;;  %v527_v29 = vpop.xlane.xlu0 %526 }
 0x275   : > { %v534_v35 = vmul.f32 0.03125, %v527_v29  ;;  %v537_v42 = vmul.f32 0.03125, %v533_v27  ;;  %v543_v48 = vmul.f32 %v1735_v44, %v1735_v44  ;;  %v559_v6 = vmul.f32 %v555_v59, %v535_v33 }
 0x277   : > { %v1737_v47 = vsub.f32 %v522_v11, %v534_v35  ;;  %v1741_v49 = vsub.f32 %v525_v12, %v537_v42  ;;  %v554_v0 = vmul.f32 96.0, %v534_v35  ;;  %v557_v8 = vmul.f32 96.0, %v537_v42 }
 0x278   : > { %v531_v38 = vpop.xlane.xlu1 %530 }
 0x279   : > { %v536_v45 = vmul.f32 0.03125, %v531_v38  ;;  %v542_v50 = vmul.f32 %v1737_v47, %v1737_v47  ;;  %v545_v52 = vmul.f32 %v1741_v49, %v1741_v49  ;;  %v558_v10 = vmul.f32 %v554_v0, %v534_v35 }
 0x27a   : > { %v561_v19 = vmul.f32 %v557_v8, %v537_v42 }
 0x27b   : > { %v1745_v51 = vsub.f32 %v524_v13, %v536_v45  ;;  %v556_v12 = vmul.f32 96.0, %v536_v45 }
 0x27d   : > { %v560_v22 = vmul.f32 %v556_v12, %v536_v45 }
 0x2d8   : > { %v1224_v28 = vpop.f32.mrb[4].mxu0 }
 0x2d9   : > { %v817_v30 = vadd.f32 %v1224_v28, %v603_v54  ;;  %v797_v31 = vpop.f32.mrb[5].mxu0 }
 0x2da   : > { %v816_v32 = vadd.f32 %v797_v31, %v1698_v53  ;;  %v544_v53 = vmul.f32 %v1745_v51, %v1745_v51 }
 0x2db   : > { %v821_v34 = vadd.f32 %v817_v30, %v521_v1 }
 0x2dc   : > { %v1227_v36 = vpop.f32.mrb[6].mxu0  ;;  %v820_v37 = vadd.f32 %v816_v32, %v521_v1 }
 0x2dd   : > { %v819_v39 = vadd.f32 %v1227_v36, %v605_v56  ;;  %v807_v40 = vpop.f32.mrb[7].mxu0  ;;  %826 = vadd.xlane.f32.xlu1 %v821_v34 }
 0x2de   : > { %v818_v41 = vadd.f32 %v807_v40, %v604_v55  ;;  %824 = vadd.xlane.f32.xlu0 %v820_v37 }
 0x2df   : > { %v823_v43 = vadd.f32 %v819_v39, %v521_v1 }
 0x2e0   : > { %v822_v46 = vadd.f32 %v818_v41, %v521_v1 }
 0x2e1   : > { %830 = vadd.xlane.f32.xlu1 %v823_v43 }
 0x2e2   : > { %828 = vadd.xlane.f32.xlu0 %v822_v46 }
 0x2e5   : > { %548 = vadd.xlane.f32.xlu1 %v543_v48 }
 0x2e6   : > { %546 = vadd.xlane.f32.xlu0 %v542_v50 }
 0x2e9   : > { %552 = vadd.xlane.f32.xlu1 %v545_v52 }
 0x2ea   : > { %550 = vadd.xlane.f32.xlu0 %v544_v53 }
 0x36a   : > { %v827_v54 = vpop.xlane.xlu1 %826 }
 0x36b   : > { %v1751_v55 = vmul.f32 0.03125, %v827_v54  ;;  %v825_v56 = vpop.xlane.xlu0 %824 }
 0x36c   : > { %v1753_v57 = vmul.f32 0.03125, %v825_v56 }
 0x36d   : > { %v1756_v58 = vsub.f32 %v821_v34, %v1751_v55  ;;  %v853_v48 = vmul.f32 96.0, %v1751_v55 }
 0x36e   : > { %v831_v60 = vpop.xlane.xlu1 %830  ;;  %v1759_v61 = vsub.f32 %v820_v37, %v1753_v57 }
 0x36f   : > { %v1761_v1 = vmul.f32 0.03125, %v831_v60  ;;  %v829_v2 = vpop.xlane.xlu0 %828  ;;  %v841_v3 = vmul.f32 %v1756_v58, %v1756_v58  ;;  %v857_v50 = vmul.f32 %v853_v48, %v1751_v55 }
 0x370   : > { %v1765_v4 = vmul.f32 0.03125, %v829_v2  ;;  %v840_v5 = vmul.f32 %v1759_v61, %v1759_v61 }
 0x371   : > { %846 = vadd.xlane.f32.xlu1 %v841_v3  ;;  %v1770_v7 = vsub.f32 %v823_v43, %v1761_v1 }
 0x372   : > { %844 = vadd.xlane.f32.xlu0 %v840_v5  ;;  %v549_v9 = vpop.xlane.xlu1 %548  ;;  %v1773_v11 = vsub.f32 %v822_v46, %v1765_v4  ;;  %v854_v54 = vmul.f32 96.0, %v1765_v4 }
 0x373   : > { %v563_v13 = vsub.f32 %v549_v9, %v559_v6  ;;  %v547_v14 = vpop.xlane.xlu0 %546  ;;  %v843_v15 = vmul.f32 %v1770_v7, %v1770_v7 }
 0x374   : > { %v562_v17 = vsub.f32 %v547_v14, %v558_v10  ;;  %v842_v16 = vmul.f32 %v1773_v11, %v1773_v11  ;;  %v858_v6 = vmul.f32 %v854_v54, %v1765_v4 }
 0x375   : > { %v567_v18 = vmul.f32 0.03125, %v563_v13  ;;  %850 = vadd.xlane.f32.xlu1 %v843_v15 }
 0x376   : > { %v566_v20 = vmul.f32 0.03125, %v562_v17  ;;  %848 = vadd.xlane.f32.xlu0 %v842_v16  ;;  %v553_v21 = vpop.xlane.xlu1 %552 }
 0x377   : > { %v571_v23 = vadd.f32 1e-05, %v567_v18  ;;  %v565_v24 = vsub.f32 %v553_v21, %v561_v19  ;;  %v551_v25 = vpop.xlane.xlu0 %550 }
 0x378   : > { %v570_v26 = vadd.f32 1e-05, %v566_v20  ;;  %v564_v27 = vsub.f32 %v551_v25, %v560_v22 }
 0x379   : > { %1381 = vrsqrt.f32 %v571_v23  ;;  %v569_v28 = vmul.f32 0.03125, %v565_v24 }
 0x37a   : > { %1383 = vrsqrt.f32 %v570_v26  ;;  %v568_v29 = vmul.f32 0.03125, %v564_v27 }
 0x37b   : > { %v573_v30 = vadd.f32 1e-05, %v569_v28 }
 0x37c   : > { %v572_v31 = vadd.f32 1e-05, %v568_v29 }
 0x37d   : > { %1385 = vrsqrt.f32 %v573_v30 }
 0x37e   : > { %1387 = vrsqrt.f32 %v572_v31 }
 0x383   : > { %v1382_v32 = vpop.eup %1381 }
 0x384   : > { %v1384_v33 = vpop.eup %1383  ;;  %v579_v34 = vmul.f32 %v1382_v32, %v1735_v44 }
 0x385   : > { %v578_v35 = vmul.f32 %v1384_v33, %v1737_v47 }
 0x386   : > { %v587_v36 = vmul.f32 %v1718_v62, %v579_v34 }
 0x387   : > { %v1386_v37 = vpop.eup %1385  ;;  %v586_v38 = vmul.f32 %v1718_v62, %v578_v35 }
 0x388   : > { %v1388_v39 = vpop.eup %1387  ;;  %v595_v40 = vadd.f32 %v1720_v63, %v587_v36  ;;  %v581_v41 = vmul.f32 %v1386_v37, %v1741_v49  ;;  %v852_v49 = vmul.f32 96.0, %v1753_v57 }
 0x389   : > { %v594_v42 = vadd.f32 %v1720_v63, %v586_v38  ;;  %v580_v43 = vmul.f32 %v1388_v39, %v1745_v51  ;;  %v855_v51 = vmul.f32 96.0, %v1761_v1 }
 0x38a   : > { %599 = vst [vmem:[%s1790_s7 + $0x8] sm:$0xff] %v595_v40  ;;  %v589_v44 = vmul.f32 %v1718_v62, %v581_v41  ;;  %v856_v53 = vmul.f32 %v852_v49, %v1753_v57 }
 0x38b   : > { %598 = vst [vmem:[%s1790_s7] sm:$0xff] %v594_v42  ;;  %v588_v45 = vmul.f32 %v1718_v62, %v580_v43  ;;  %v859_v2 = vmul.f32 %v855_v51, %v1761_v1 }
 0x38c   : > { %v597_v46 = vadd.f32 %v1720_v63, %v589_v44 }
 0x38d   : > { %v596_v47 = vadd.f32 %v1720_v63, %v588_v45 }
 0x38e   : > { %601 = vst [vmem:[%s1790_s7 + $0x18] sm:$0xff] %v597_v46 }
 0x38f   : > { %600 = vst [vmem:[%s1790_s7 + $0x10] sm:$0xff] %v596_v47 }
 0x3fe   : > { %v847_v52 = vpop.xlane.xlu1 %846 }
 0x3ff   : > { %v861_v56 = vsub.f32 %v847_v52, %v857_v50  ;;  %v845_v59 = vpop.xlane.xlu0 %844 }
 0x400   : > { %v860_v60 = vsub.f32 %v845_v59, %v856_v53 }
 0x401   : > { %v865_v0 = vmul.f32 0.03125, %v861_v56 }
 0x402   : > { %v864_v3 = vmul.f32 0.03125, %v860_v60  ;;  %v851_v5 = vpop.xlane.xlu1 %850 }
 0x403   : > { %v869_v8 = vadd.f32 1e-05, %v865_v0  ;;  %v863_v9 = vsub.f32 %v851_v5, %v859_v2  ;;  %v849_v55 = vpop.xlane.xlu0 %848 }
 0x404   : > { %v868_v10 = vadd.f32 1e-05, %v864_v3  ;;  %v862_v12 = vsub.f32 %v849_v55, %v858_v6 }
 0x405   : > { %1389 = vrsqrt.f32 %v869_v8  ;;  %v867_v13 = vmul.f32 0.03125, %v863_v9 }
 0x406   : > { %1391 = vrsqrt.f32 %v868_v10  ;;  %v866_v57 = vmul.f32 0.03125, %v862_v12 }
 0x407   : > { %v871_v14 = vadd.f32 1e-05, %v867_v13 }
 0x408   : > { %v870_v15 = vadd.f32 1e-05, %v866_v57 }
 0x409   : > { %1393 = vrsqrt.f32 %v871_v14 }
 0x40a   : > { %1395 = vrsqrt.f32 %v870_v15 }
 0x40f   : > { %v1390_v1 = vpop.eup %1389 }
 0x410   : > { %v1392_v17 = vpop.eup %1391  ;;  %v877_v4 = vmul.f32 %v1390_v1, %v1756_v58 }
 0x411   : > { %v876_v16 = vmul.f32 %v1392_v17, %v1759_v61 }
 0x412   : > { %v881_v18 = vmul.f32 %v877_v4, %v1718_v62 }
 0x413   : > { %v1394_v19 = vpop.eup %1393  ;;  %v880_v20 = vmul.f32 %v876_v16, %v1718_v62 }
 0x414   : > { %v1396_v21 = vpop.eup %1395  ;;  %v885_v22 = vadd.f32 %v881_v18, %v1720_v63  ;;  %v879_v23 = vmul.f32 %v1394_v19, %v1770_v7 }
 0x415   : > { %v884_v24 = vadd.f32 %v880_v20, %v1720_v63  ;;  %v878_v25 = vmul.f32 %v1396_v21, %v1773_v11 }
 0x416   : > { %889 = vst [vmem:[%s1790_s7 + $0x28] sm:$0xff] %v885_v22  ;;  %v883_v58 = vmul.f32 %v879_v23, %v1718_v62 }
 0x417   : > { %888 = vst [vmem:[%s1790_s7 + $0x20] sm:$0xff] %v884_v24  ;;  %v882_v61 = vmul.f32 %v878_v25, %v1718_v62 }
 0x418   : > { %v887_v26 = vadd.f32 %v883_v58, %v1720_v63 }
 0x419   : > { %v886_v7 = vadd.f32 %v882_v61, %v1720_v63 }
 0x41a   : > { %891 = vst [vmem:[%s1790_s7 + $0x38] sm:$0xff] %v887_v26 }
 0x41b   : > { %890 = vst [vmem:[%s1790_s7 + $0x30] sm:$0xff] %v886_v7 }
 0x41c   : > { %1410 = shalt.err (!%p1407_p5)
}
 0x41d   : > { %s1411_s24 = scalar_lea.hbm %s1826_s12, 1024  ;;  %s1415_s17 = scalar_lea.hbm %s1886_s5, 2048 }
 0x41e   : > { %p1412_p6 = scmp.ne.s32.totalorder %s1826_s12, %s1411_s24  ;;  %p1416_p10 = scmp.lt.u32.totalorder %s1826_s12, %s1886_s5 }
 0x41f   : > { %p1417_p11 = scmp.lt.u32.totalorder %s1415_s17, %s1411_s24  ;;  %p1419_p13 = scmp.lt.u32.totalorder %s1411_s24, %s1826_s12 }
 0x420   : > { %p1413_p7 = pnand %p1412_p6, %p1550_p4 }
 0x421   : > { %p1418_p12 = por %p1417_p11, %p1416_p10 }
 0x422   : > { %p1414_p9 = pneg %p1413_p7 }
 0x423   : > { %p1420_p0 = por %p1419_p13, %p1418_p12 }
 0x425   : > { %p1421_p1 = pnand %p1420_p0, %p1414_p9 }
 0x427   : > { %1424 = shalt.err (!%p1421_p1)
}
 0x428   : > { %s1478_s8 = smov 128   ;;  %s1479_s10 = smov 8  }
 0x429   : > { %1324 = dma.vmem_to_hbm [thread:$0]  (%p1550_p4), %s1828_s9, 1024, %s1826_s12, %s1835_s21, %s1478_s8, %s1478_s8, %s1479_s10  }
 0x42a PF: > { %p1330_p2 = scmp.ge.s32.totalorder %s1475_s23, 2  ;;  %s921_s11 = sand.u32 1, %s1455_s18  }
 0x42b   : > { %s922_s14 = scalar_lea.sflag [#allocation3], %s921_s11 }
 0x42c   : > { %p1327_p3 = pnand %p1330_p2, %p1557_p8 }
 0x42e   : > { %1450 = dma.done.wait (!%p1327_p3), %s922_s14, 1024  }
 0x42f   : > { %1452 = vsyncadd (!%p1327_p3), %s922_s14, 4294966272  ;;  %s18_s23 = sadd.s32 1, %s1475_s23   ;;  %s1889_s18 = smov %s1459_s19 }
 0x430   : > { %p15_p5 = scmp.ge.s32.totalorder %s18_s23, 4   ;;  %s1890_s19 = smov %s1463_s20 }
 0x431   : > { %s1891_s20 = smov %s1563_s6  ;;  %s1892_s21 = smov %s1471_s22 }
 0x432   : > { %s1893_s22 = smov %s1895_s26  ;;  %17 = sbr.rel (!%p15_p5) target bundleno = 4 (0x4), region = 84 }
 0x439   :  { %927 = vsyncpa [#allocation3], 1 }
 0x43a   :  { %929 = vsyncpa [#allocation3 + $0x1], 1 }

</bundles_post_ra>
